<compile_context>
chip_gen: v5e
topology: v5e:2x2
jax: 0.10.0
libtpu: 0.0.40
codegen_flags: <defaults>
</compile_context>

<pallas_src>
import jax
import jax.numpy as jnp
from jax.experimental import pallas as pl

# ---------------- model / problem sizes (small, consistent with the module) ---
B = 2              # batch
IMG = 16           # spatial
DEPTH_C = 1        # depth channels
RGB_C = 3          # rgb channels
EMB = 32           # every sensor embedding is 32-d (nn.Linear/Embedding(..., 32))
DEPTH_OUT = 32     # DEPTH_ENCODER.output_size
RGB_OUT = 32       # RGB_ENCODER.output_size
HIDDEN = 64        # STATE_ENCODER.hidden_size
N_OBJ = 6          # objectgoal categories = high[0] + 1
NUM_ACTIONS = 4    # prev_action_embedding has NUM_ACTIONS + 1 rows
RNN_IN = DEPTH_OUT + RGB_OUT + 4 * EMB               # 192
GATES = 3 * HIDDEN                                   # 192 (r|z|n)
OBS_LIN = DEPTH_C * IMG * IMG + RGB_C * IMG * IMG + 2 + N_OBJ + (NUM_ACTIONS + 1)  # 1037

PARAM_NAMES = (
    "wd", "wr",                                 # stand-in depth / rgb encoders
    "wg", "bg",                                 # gps_embedding
    "wc0", "wc1", "bc",                         # compass_embedding (rows of W^T split)
    "eo", "ea",                                 # objectgoal / prev-action embedding tables
    "wir", "wiz", "win", "bir", "biz", "bin",   # GRU input->hidden (r, z, n)
    "whr", "whz", "whn", "bhr", "bhz", "bhn",   # GRU hidden->hidden (r, z, n)
)


# ------------------------------- Pallas kernel -------------------------------
def _seq2seq_kernel(obs_ref, state_ref, w_in_ref, w_hh_ref, aux_ref, h_out_ref):
    # obs_ref   : [B, 1037] bf16  = [depth | rgb | gps | objgoal_1hot | prevact_1hot]
    # state_ref : [B, 66]   f32   = [h0 (64) | compass (1) | mask (1)]
    # w_in_ref  : [1037, 192] bf16  folded (encoders @ W_ih) for all linear sensors
    # w_hh_ref  : [64, 192]  bf16  fused hidden->hidden weights (r|z|n)
    # aux_ref   : [4, 192]   f32   rows: wc_cos_fold, wc_sin_fold, b_x_fold, b_hh
    # h_out_ref : [B, 64]    f32

    # --- whole linear input path: a single MXU pass ------------------------
    gx = jnp.dot(obs_ref[...], w_in_ref[...],
                 preferred_element_type=jnp.float32)              # [B, 192]

    # --- compass (nonlinear): cos/sin on the EUP, folded weight rows -------
    comp = state_ref[:, HIDDEN:HIDDEN + 1]                        # [B, 1]
    gx = (gx
          + jnp.cos(comp) * aux_ref[0:1, :]
          + jnp.sin(comp) * aux_ref[1:2, :]
          + aux_ref[2:3, :])                                      # + folded input bias

    # --- RNNStateEncoder: single-layer GRU, single step --------------------
    mask = state_ref[:, HIDDEN + 1:HIDDEN + 2]                    # [B, 1]
    h = state_ref[:, 0:HIDDEN] * mask                             # masked hidden, f32
    gh = jnp.dot(h.astype(jnp.bfloat16), w_hh_ref[...],
                 preferred_element_type=jnp.float32) + aux_ref[3:4, :]   # [B, 192]

    # r and z share one 128-lane sigmoid; n keeps its r-gated tanh.
    rz = jax.nn.sigmoid(gx[:, 0:2 * HIDDEN] + gh[:, 0:2 * HIDDEN])        # [B, 128]
    r = rz[:, 0:HIDDEN]
    z = rz[:, HIDDEN:2 * HIDDEN]
    n = jnp.tanh(gx[:, 2 * HIDDEN:GATES] + r * gh[:, 2 * HIDDEN:GATES])
    h_out_ref[...] = (1.0 - z) * n + z * h


# ------------------------------- weight folding --------------------------------
def fold_params(params):
    """Fold every linear sensor encoder into the fused GRU input weight (host/JAX
    side, done once). Valid while the depth/rgb encoders are linear stand-ins."""
    hp = lambda a, b: jnp.dot(a, b, precision=jax.lax.Precision.HIGHEST)

    w_ih = jnp.concatenate([params["wir"], params["wiz"], params["win"]], axis=1)  # [192,192]
    b_ih = jnp.concatenate([params["bir"], params["biz"], params["bin"]], axis=1)  # [1,192]
    w_hh = jnp.concatenate([params["whr"], params["whz"], params["whn"]], axis=1)  # [64,192]
    b_hh = jnp.concatenate([params["bhr"], params["bhz"], params["bhn"]], axis=1)  # [1,192]

    # rows of the 192-wide feature vector, matching
    # torch.cat([depth, rgb, gps, compass, objgoal, prev_act], dim=1)
    w_d, w_r = w_ih[0:32], w_ih[32:64]
    w_g, w_c = w_ih[64:96], w_ih[96:128]
    w_o, w_a = w_ih[128:160], w_ih[160:192]

    w_in = jnp.concatenate([
        hp(params["wd"], w_d),      # depth      [256, 192]
        hp(params["wr"], w_r),      # rgb        [768, 192]
        hp(params["wg"], w_g),      # gps        [2,   192]
        hp(params["eo"], w_o),      # objectgoal [6,   192]
        hp(params["ea"], w_a),      # prev act   [5,   192]
    ], axis=0)                      # [1037, 192]

    wc_cos = hp(params["wc0"], w_c)                               # [1, 192]
    wc_sin = hp(params["wc1"], w_c)                               # [1, 192]
    b_x = hp(params["bg"], w_g) + hp(params["bc"], w_c) + b_ih    # [1, 192]
    aux = jnp.concatenate([wc_cos, wc_sin, b_x, b_hh], axis=0)    # [4, 192]

    return {
        "w_in": w_in.astype(jnp.bfloat16),
        "w_hh": w_hh.astype(jnp.bfloat16),
        "aux": aux.astype(jnp.float32),
    }


# ------------------------------- wrapper --------------------------------------
def _prepare_inputs(observations, rnn_hidden_states, prev_actions, masks):
    depth = observations["depth"].reshape(B, -1).astype(jnp.float32)     # [B, 256]
    rgb = observations["rgb"].reshape(B, -1).astype(jnp.float32)         # [B, 768]
    gps = observations["gps"].astype(jnp.float32)                        # [B, 2]
    compass = observations["compass"].astype(jnp.float32)                # [B, 1]
    masks_f = masks.astype(jnp.float32)                                  # [B, 1]
    obj_oh = jax.nn.one_hot(observations["objectgoal"].reshape(-1),
                            N_OBJ, dtype=jnp.float32)                    # [B, 6]
    act_idx = ((prev_actions.astype(jnp.float32) + 1.0) * masks_f)
    act_oh = jax.nn.one_hot(act_idx.astype(jnp.int32).reshape(-1),
                            NUM_ACTIONS + 1, dtype=jnp.float32)          # [B, 5]
    h0 = rnn_hidden_states[0].astype(jnp.float32)                        # [B, 64]

    obs = jnp.concatenate([depth, rgb, gps, obj_oh, act_oh], axis=-1)    # [B, 1037]
    state = jnp.concatenate([h0, compass, masks_f], axis=-1)             # [B, 66]
    return obs.astype(jnp.bfloat16), state


def seq2seq_forward(folded, observations, rnn_hidden_states, prev_actions, masks):
    obs, state = _prepare_inputs(observations, rnn_hidden_states, prev_actions, masks)
    h_new = pl.pallas_call(
        _seq2seq_kernel,
        out_shape=jax.ShapeDtypeStruct((B, HIDDEN), jnp.float32),
    )(obs, state, folded["w_in"], folded["w_hh"], folded["aux"])
    # (x, rnn_hidden_states): x is the GRU output == new hidden; restore layout
    return h_new, h_new[None]


# ------------------------------- params & reference ---------------------------
def init_params(key):
    shapes = {
        "wd": (DEPTH_C * IMG * IMG, DEPTH_OUT),
        "wr": (RGB_C * IMG * IMG, RGB_OUT),
        "wg": (2, EMB), "bg": (1, EMB),
        "wc0": (1, EMB), "wc1": (1, EMB), "bc": (1, EMB),
        "eo": (N_OBJ, EMB), "ea": (NUM_ACTIONS + 1, EMB),
        "wir": (RNN_IN, HIDDEN), "wiz": (RNN_IN, HIDDEN), "win": (RNN_IN, HIDDEN),
        "bir": (1, HIDDEN), "biz": (1, HIDDEN), "bin": (1, HIDDEN),
        "whr": (HIDDEN, HIDDEN), "whz": (HIDDEN, HIDDEN), "whn": (HIDDEN, HIDDEN),
        "bhr": (1, HIDDEN), "bhz": (1, HIDDEN), "bhn": (1, HIDDEN),
    }
    params = {}
    for i, (name, shape) in enumerate(shapes.items()):
        k = jax.random.fold_in(key, i)
        scale = 1.0 / jnp.sqrt(jnp.maximum(shape[0], 1)).astype(jnp.float32)
        params[name] = scale * jax.random.normal(k, shape, jnp.float32)
    return params


def reference(params, observations, rnn_hidden_states, prev_actions, masks):
    """Unfused, module-faithful f32 math (depth/rgb encoders as the same linear
    stand-ins)."""
    p = params
    depth = observations["depth"].reshape(B, -1).astype(jnp.float32)
    rgb = observations["rgb"].reshape(B, -1).astype(jnp.float32)
    gps = observations["gps"].astype(jnp.float32)
    compass = observations["compass"].astype(jnp.float32)
    masks_f = masks.astype(jnp.float32)
    obj_oh = jax.nn.one_hot(observations["objectgoal"].reshape(-1), N_OBJ,
                            dtype=jnp.float32)
    act_idx = ((prev_actions.astype(jnp.float32) + 1.0) * masks_f).astype(jnp.int32)
    act_oh = jax.nn.one_hot(act_idx.reshape(-1), NUM_ACTIONS + 1, dtype=jnp.float32)

    d = depth @ p["wd"]
    r = rgb @ p["wr"]
    g = gps @ p["wg"] + p["bg"]
    comp = jnp.concatenate([jnp.cos(compass), jnp.sin(compass)], -1)
    c = comp @ jnp.concatenate([p["wc0"], p["wc1"]], 0) + p["bc"]
    o = obj_oh @ p["eo"]
    a = act_oh @ p["ea"]
    x = jnp.concatenate([d, r, g, c, o, a], -1)

    h = rnn_hidden_states[0].astype(jnp.float32) * masks_f
    rr = jax.nn.sigmoid(x @ p["wir"] + p["bir"] + h @ p["whr"] + p["bhr"])
    zz = jax.nn.sigmoid(x @ p["wiz"] + p["biz"] + h @ p["whz"] + p["bhz"])
    nn_ = jnp.tanh(x @ p["win"] + p["bin"] + rr * (h @ p["whn"] + p["bhn"]))
    return (1.0 - zz) * nn_ + zz * h


# ------------------------------------ main -------------------------------------
if __name__ == "__main__":
    key = jax.random.PRNGKey(0)
    params = init_params(key)
    folded = fold_params(params)

    observations = {
        "depth": jax.random.uniform(jax.random.fold_in(key, 101), (B, DEPTH_C, IMG, IMG)),
        "rgb": jax.random.uniform(jax.random.fold_in(key, 102), (B, RGB_C, IMG, IMG)),
        "gps": jax.random.normal(jax.random.fold_in(key, 103), (B, 2)),
        "compass": jax.random.uniform(jax.random.fold_in(key, 104), (B, 1),
                                      minval=-3.14, maxval=3.14),
        "objectgoal": jax.random.randint(jax.random.fold_in(key, 105), (B, 1), 0, N_OBJ),
    }
    prev_actions = jax.random.randint(jax.random.fold_in(key, 106), (B, 1), 0, NUM_ACTIONS)
    masks = jnp.ones((B, 1), jnp.float32)
    rnn_hidden_states = jax.random.normal(jax.random.fold_in(key, 107), (1, B, HIDDEN))

    x, h_new = seq2seq_forward(folded, observations, rnn_hidden_states,
                               prev_actions, masks)
    jax.block_until_ready((x, h_new))

    # correctness check against a pure-JAX f32 reference of the unfused module
    # math (tolerance covers the bf16 matmul operands used inside the kernel)
    ref = reference(params, observations, rnn_hidden_states, prev_actions, masks)
    assert x.shape == (B, HIDDEN) and h_new.shape == (1, B, HIDDEN)
    assert jnp.allclose(x, ref, atol=1e-2, rtol=1e-2)
    assert jnp.allclose(h_new[0], ref, atol=1e-2, rtol=1e-2)

    print("KERNEL_OK")
</pallas_src>

<mosaic_0001>
module attributes {stable_mosaic.version = 11 : i64} {
  func.func @_seq2seq_kernel(%arg0: memref<2x1037xbf16, #tpu.memory_space<vmem>>, %arg1: memref<2x66xf32, #tpu.memory_space<vmem>>, %arg2: memref<1037x192xbf16, #tpu.memory_space<vmem>>, %arg3: memref<64x192xbf16, #tpu.memory_space<vmem>>, %arg4: memref<4x192xf32, #tpu.memory_space<vmem>>, %arg5: memref<2x64xf32, #tpu.memory_space<vmem>>) attributes {dimension_semantics = [], scalar_prefetch = 0 : i64, scratch_operands = 0 : i64, tpu.core_type = #tpu.core_type<tc>} {
    %c0 = arith.constant 0 : index
    %c0_0 = arith.constant 0 : index
    %0 = vector.load %arg0[%c0, %c0_0] : memref<2x1037xbf16, #tpu.memory_space<vmem>>, vector<2x1037xbf16>
    %c0_1 = arith.constant 0 : index
    %c0_2 = arith.constant 0 : index
    %1 = vector.load %arg2[%c0_1, %c0_2] : memref<1037x192xbf16, #tpu.memory_space<vmem>>, vector<1037x192xbf16>
    %cst = arith.constant dense<0.000000e+00> : vector<2x192xf32>
    %2 = tpu.matmul %0, %1, %cst {dimension_numbers = #tpu.dot_dimension_numbers<[1], [0], [0], [1], [0, 0, 1, 1], [], []>} : vector<2x1037xbf16>, vector<1037x192xbf16>, vector<2x192xf32> -> vector<2x192xf32>
    %c0_3 = arith.constant 0 : index
    %c64 = arith.constant 64 : index
    %3 = vector.load %arg1[%c0_3, %c64] : memref<2x66xf32, #tpu.memory_space<vmem>>, vector<2x1xf32>
    %4 = math.cos %3 : vector<2x1xf32>
    %c0_4 = arith.constant 0 : index
    %c0_5 = arith.constant 0 : index
    %5 = vector.load %arg4[%c0_4, %c0_5] : memref<4x192xf32, #tpu.memory_space<vmem>>, vector<1x192xf32>
    %6 = vector.broadcast %4 : vector<2x1xf32> to vector<2x192xf32>
    %7 = vector.broadcast %5 : vector<1x192xf32> to vector<2x192xf32>
    %8 = arith.mulf %6, %7 : vector<2x192xf32>
    %9 = arith.addf %2, %8 : vector<2x192xf32>
    %10 = math.sin %3 : vector<2x1xf32>
    %c1 = arith.constant 1 : index
    %c0_6 = arith.constant 0 : index
    %11 = vector.load %arg4[%c1, %c0_6] : memref<4x192xf32, #tpu.memory_space<vmem>>, vector<1x192xf32>
    %12 = vector.broadcast %10 : vector<2x1xf32> to vector<2x192xf32>
    %13 = vector.broadcast %11 : vector<1x192xf32> to vector<2x192xf32>
    %14 = arith.mulf %12, %13 : vector<2x192xf32>
    %15 = arith.addf %9, %14 : vector<2x192xf32>
    %c2 = arith.constant 2 : index
    %c0_7 = arith.constant 0 : index
    %16 = vector.load %arg4[%c2, %c0_7] : memref<4x192xf32, #tpu.memory_space<vmem>>, vector<1x192xf32>
    %17 = vector.broadcast %16 : vector<1x192xf32> to vector<2x192xf32>
    %18 = arith.addf %15, %17 : vector<2x192xf32>
    %c0_8 = arith.constant 0 : index
    %c65 = arith.constant 65 : index
    %19 = vector.load %arg1[%c0_8, %c65] : memref<2x66xf32, #tpu.memory_space<vmem>>, vector<2x1xf32>
    %c0_9 = arith.constant 0 : index
    %c0_10 = arith.constant 0 : index
    %20 = vector.load %arg1[%c0_9, %c0_10] : memref<2x66xf32, #tpu.memory_space<vmem>>, vector<2x64xf32>
    %21 = vector.broadcast %19 : vector<2x1xf32> to vector<2x64xf32>
    %22 = arith.mulf %20, %21 : vector<2x64xf32>
    %23 = arith.truncf %22 : vector<2x64xf32> to vector<2x64xbf16>
    %c0_11 = arith.constant 0 : index
    %c0_12 = arith.constant 0 : index
    %24 = vector.load %arg3[%c0_11, %c0_12] : memref<64x192xbf16, #tpu.memory_space<vmem>>, vector<64x192xbf16>
    %cst_13 = arith.constant dense<0.000000e+00> : vector<2x192xf32>
    %25 = tpu.matmul %23, %24, %cst_13 {dimension_numbers = #tpu.dot_dimension_numbers<[1], [0], [0], [1], [0, 0, 1, 1], [], []>} : vector<2x64xbf16>, vector<64x192xbf16>, vector<2x192xf32> -> vector<2x192xf32>
    %c3 = arith.constant 3 : index
    %c0_14 = arith.constant 0 : index
    %26 = vector.load %arg4[%c3, %c0_14] : memref<4x192xf32, #tpu.memory_space<vmem>>, vector<1x192xf32>
    %27 = vector.broadcast %26 : vector<1x192xf32> to vector<2x192xf32>
    %28 = arith.addf %25, %27 : vector<2x192xf32>
    %29 = vector.extract_strided_slice %18 {offsets = [0, 0], sizes = [2, 128], strides = [1, 1]} : vector<2x192xf32> to vector<2x128xf32>
    %30 = vector.extract_strided_slice %28 {offsets = [0, 0], sizes = [2, 128], strides = [1, 1]} : vector<2x192xf32> to vector<2x128xf32>
    %31 = arith.addf %29, %30 : vector<2x128xf32>
    %32 = arith.negf %31 : vector<2x128xf32>
    %33 = math.exp %32 : vector<2x128xf32>
    %cst_15 = arith.constant 1.000000e+00 : f32
    %34 = vector.broadcast %cst_15 : f32 to vector<2x128xf32>
    %35 = arith.addf %34, %33 : vector<2x128xf32>
    %36 = arith.divf %34, %35 : vector<2x128xf32>
    %37 = vector.extract_strided_slice %36 {offsets = [0, 0], sizes = [2, 64], strides = [1, 1]} : vector<2x128xf32> to vector<2x64xf32>
    %38 = vector.extract_strided_slice %36 {offsets = [0, 64], sizes = [2, 64], strides = [1, 1]} : vector<2x128xf32> to vector<2x64xf32>
    %39 = vector.extract_strided_slice %18 {offsets = [0, 128], sizes = [2, 64], strides = [1, 1]} : vector<2x192xf32> to vector<2x64xf32>
    %40 = vector.extract_strided_slice %28 {offsets = [0, 128], sizes = [2, 64], strides = [1, 1]} : vector<2x192xf32> to vector<2x64xf32>
    %41 = arith.mulf %37, %40 : vector<2x64xf32>
    %42 = arith.addf %39, %41 : vector<2x64xf32>
    %43 = math.tanh %42 : vector<2x64xf32>
    %cst_16 = arith.constant 1.000000e+00 : f32
    %44 = vector.broadcast %cst_16 : f32 to vector<2x64xf32>
    %45 = arith.subf %44, %38 : vector<2x64xf32>
    %46 = arith.mulf %45, %43 : vector<2x64xf32>
    %47 = arith.mulf %38, %22 : vector<2x64xf32>
    %48 = arith.addf %46, %47 : vector<2x64xf32>
    %c0_17 = arith.constant 0 : index
    %c0_18 = arith.constant 0 : index
    %49 = vector.load %arg5[%c0_17, %c0_18] : memref<2x64xf32, #tpu.memory_space<vmem>>, vector<2x64xf32>
    tpu.vector_store %arg5[%c0_17, %c0_18], %48 {strides = array<i32>} : memref<2x64xf32, #tpu.memory_space<vmem>>, vector<2x64xf32>,
    return
  }
}

</mosaic_0001>

<bundles_post_ra>
// kernel: tpu_custom_call.1
= control target key start
LH: loop header
LB: loop body
LE: loop exit
PB: predicated region body
PF: predicated region fallthrough
CT: control target
= control target key end

     0   :  { %v2321_v39 = vmov 65   ;;  %vm994_vm0 = vcmask 1045504   ;;  %vm995_vm1 = vcmask 1046528   ;;  %s3406_s0 = inlined_call_operand.vmem [shape: bf16[2,1037], index: 0, kind: input, shape index: {}]   ;;  %s3407_s1 = inlined_call_operand.vmem [shape: f32[2,66], index: 1, kind: input, shape index: {}]   ;;  %s3408_s2 = inlined_call_operand.vmem [shape: bf16[1037,192], index: 2, kind: input, shape index: {}]   ;;  %s3409_s3 = inlined_call_operand.vmem [shape: bf16[64,192], index: 3, kind: input, shape index: {}]   ;;  %s3410_s4 = inlined_call_operand.vmem [shape: f32[4,192], index: 4, kind: input, shape index: {}]   ;;  %s3411_s5 = inlined_call_operand.hbm [shape: f32[2,64], index: 5, kind: output, shape index: {}]  }
   0x1   :  { %v1693_v0 = vld [vmem:[%s3408_s2 + $0xf0] sm:$0xf]  ;;  %v2165_v1 = vld [vmem:[%s3408_s2 + $0xf4] sm:$0xf0]  ;;  %v1685_v9 = vld [vmem:[%s3408_s2 + $0xe0] sm:$0xf]  ;;  %2284 = vset.pattern.permute.xlu0 %v2321_v39 }
   0x2   :  { %v1757_v2 = vld [vmem:[%s3408_s2 + $0x170] sm:$0xf]  ;;  %v1694_v3 = vor.u32 %v2165_v1, %v1693_v0  ;;  %v2181_v4 = vld [vmem:[%s3408_s2 + $0x174] sm:$0xf0]  ;;  %v2163_v10 = vld [vmem:[%s3408_s2 + $0xe4] sm:$0xf0] }
   0x3   :  { %v1821_v5 = vld [vmem:[%s3408_s2 + $0x1f0] sm:$0xf]  ;;  %v2197_v6 = vld [vmem:[%s3408_s2 + $0x1f4] sm:$0xf0]  ;;  %v1758_v7 = vor.u32 %v2181_v4, %v1757_v2  ;;  %v1749_v11 = vld [vmem:[%s3408_s2 + $0x160] sm:$0xf]  ;;  %v1686_v12 = vor.u32 %v2163_v10, %v1685_v9 }
   0x4   :  { %v1822_v8 = vor.u32 %v2197_v6, %v1821_v5  ;;  %1017 = vmatpush.bf16.msra.mxu1 %v1694_v3  ;;  %v2179_v13 = vld [vmem:[%s3408_s2 + $0x164] sm:$0xf0]  ;;  %v1813_v14 = vld [vmem:[%s3408_s2 + $0x1e0] sm:$0xf]  ;;  %v1629_v18 = vld [vmem:[%s3408_s2 + $0x70] sm:$0xf] }
   0x5   :  { %v2195_v15 = vld [vmem:[%s3408_s2 + $0x1e4] sm:$0xf0]  ;;  %1030 = vmatpush.bf16.msra.mxu2 %v1758_v7  ;;  %v1750_v16 = vor.u32 %v2179_v13, %v1749_v11  ;;  %v2149_v19 = vld [vmem:[%s3408_s2 + $0x74] sm:$0xf0]  ;;  %v1677_v20 = vld [vmem:[%s3408_s2 + $0xd0] sm:$0xf] }
   0x6   :  { %1043 = vmatpush.bf16.msra.mxu3 %v1822_v8  ;;  %v1814_v17 = vor.u32 %v2195_v15, %v1813_v14  ;;  %v1630_v21 = vor.u32 %v2149_v19, %v1629_v18  ;;  %v2161_v22 = vld [vmem:[%s3408_s2 + $0xd4] sm:$0xf0]  ;;  %v1741_v23 = vld [vmem:[%s3408_s2 + $0x150] sm:$0xf]  ;;  %v1621_v27 = vld [vmem:[%s3408_s2 + $0x60] sm:$0xf] }
   0x7   :  { %v2177_v24 = vld [vmem:[%s3408_s2 + $0x154] sm:$0xf0]  ;;  %v1805_v25 = vld [vmem:[%s3408_s2 + $0x1d0] sm:$0xf]  ;;  %v1678_v28 = vor.u32 %v2161_v22, %v1677_v20  ;;  %v2147_v29 = vld [vmem:[%s3408_s2 + $0x64] sm:$0xf0] }
   0x8   :  { %v2193_v26 = vld [vmem:[%s3408_s2 + $0x1d4] sm:$0xf0]  ;;  %1018 = vmatpush.bf16.msra.mxu1 %v1686_v12  ;;  %1004 = vmatpush.bf16.msra.mxu0 %v1630_v21  ;;  %v1669_v30 = vld [vmem:[%s3408_s2 + $0xc0] sm:$0xf]  ;;  %v1742_v31 = vor.u32 %v2177_v24, %v1741_v23  ;;  %v1622_v33 = vor.u32 %v2147_v29, %v1621_v27  ;;  %v2159_v34 = vld [vmem:[%s3408_s2 + $0xc4] sm:$0xf0] }
   0x9   :  { %1031 = vmatpush.bf16.msra.mxu2 %v1750_v16  ;;  %v1806_v32 = vor.u32 %v2193_v26, %v1805_v25  ;;  %v1733_v35 = vld [vmem:[%s3408_s2 + $0x140] sm:$0xf]  ;;  %v2175_v36 = vld [vmem:[%s3408_s2 + $0x144] sm:$0xf0]  ;;  %v1613_v41 = vld [vmem:[%s3408_s2 + $0x50] sm:$0xf]  ;;  %v1670_v43 = vor.u32 %v2159_v34, %v1669_v30 }
   0xa   :  { %1044 = vmatpush.bf16.msra.mxu3 %v1814_v17  ;;  %v1797_v37 = vld [vmem:[%s3408_s2 + $0x1c0] sm:$0xf]  ;;  %v2191_v38 = vld [vmem:[%s3408_s2 + $0x1c4] sm:$0xf0]  ;;  %v2145_v42 = vld [vmem:[%s3408_s2 + $0x54] sm:$0xf0]  ;;  %v1734_v47 = vor.u32 %v2175_v36, %v1733_v35 }
   0xb   :  { %v1418_v40 = vld [vmem:[%s3407_s1] sm:$0x3]  ;;  %v1614_v44 = vor.u32 %v2145_v42, %v1613_v41  ;;  %v1661_v45 = vld [vmem:[%s3408_s2 + $0xb0] sm:$0xf]  ;;  %v2157_v46 = vld [vmem:[%s3408_s2 + $0xb4] sm:$0xf0]  ;;  %v1798_v48 = vor.u32 %v2191_v38, %v1797_v37 }
   0xc   :  { %1019 = vmatpush.bf16.msra.mxu1 %v1678_v28  ;;  %1005 = vmatpush.bf16.msra.mxu0 %v1622_v33  ;;  %v1725_v49 = vld [vmem:[%s3408_s2 + $0x130] sm:$0xf]  ;;  %v2173_v50 = vld [vmem:[%s3408_s2 + $0x134] sm:$0xf0]  ;;  %v1605_v51 = vld [vmem:[%s3408_s2 + $0x40] sm:$0xf]  ;;  %v1662_v55 = vor.u32 %v2157_v46, %v1661_v45 }
   0xd   :  { %1032 = vmatpush.bf16.msra.mxu2 %v1742_v31  ;;  %1421 = vperm.xlu0 %2284, %v1418_v40   ;;  %v1789_v52 = vld [vmem:[%s3408_s2 + $0x1b0] sm:$0xf]  ;;  %v2189_v53 = vld [vmem:[%s3408_s2 + $0x1b4] sm:$0xf0]  ;;  %v2143_v54 = vld [vmem:[%s3408_s2 + $0x44] sm:$0xf0]  ;;  %v1726_v59 = vor.u32 %v2173_v50, %v1725_v49 }
   0xe   :  { %1045 = vmatpush.bf16.msra.mxu3 %v1806_v32  ;;  %v1606_v56 = vor.u32 %v2143_v54, %v1605_v51  ;;  %v1653_v57 = vld [vmem:[%s3408_s2 + $0xa0] sm:$0xf]  ;;  %v2155_v58 = vld [vmem:[%s3408_s2 + $0xa4] sm:$0xf0]  ;;  %v1790_v60 = vor.u32 %v2189_v53, %v1789_v52  ;;  %v1597_v62 = vld [vmem:[%s3408_s2 + $0x30] sm:$0xf] }
   0xf   :  { %v1717_v61 = vld [vmem:[%s3408_s2 + $0x120] sm:$0xf]  ;;  %v2141_v63 = vld [vmem:[%s3408_s2 + $0x34] sm:$0xf0]  ;;  %v2171_v0 = vld [vmem:[%s3408_s2 + $0x124] sm:$0xf0]  ;;  %v1654_v3 = vor.u32 %v2155_v58, %v1653_v57 }
  0x10   :  { %1020 = vmatpush.bf16.msra.mxu1 %v1670_v43  ;;  %1006 = vmatpush.bf16.msra.mxu0 %v1614_v44  ;;  %v1781_v1 = vld [vmem:[%s3408_s2 + $0x1a0] sm:$0xf]  ;;  %v2187_v2 = vld [vmem:[%s3408_s2 + $0x1a4] sm:$0xf0]  ;;  %v1598_v4 = vor.u32 %v2141_v63, %v1597_v62  ;;  %v1645_v5 = vld [vmem:[%s3408_s2 + $0x90] sm:$0xf]  ;;  %v1718_v7 = vor.u32 %v2171_v0, %v1717_v61 }
  0x11   :  { %1033 = vmatpush.bf16.msra.mxu2 %v1734_v47  ;;  %v2153_v6 = vld [vmem:[%s3408_s2 + $0x94] sm:$0xf0]  ;;  %v1782_v8 = vor.u32 %v2187_v2, %v1781_v1  ;;  %v1709_v9 = vld [vmem:[%s3408_s2 + $0x110] sm:$0xf]  ;;  %v1589_v10 = vld [vmem:[%s3408_s2 + $0x20] sm:$0xf] }
  0x12   :  { %1046 = vmatpush.bf16.msra.mxu3 %v1798_v48  ;;  %v2139_v11 = vld [vmem:[%s3408_s2 + $0x24] sm:$0xf0]  ;;  %v2169_v12 = vld [vmem:[%s3408_s2 + $0x114] sm:$0xf0]  ;;  %v1773_v13 = vld [vmem:[%s3408_s2 + $0x190] sm:$0xf]  ;;  %v1646_v15 = vor.u32 %v2153_v6, %v1645_v5 }
  0x13   :  { %v2185_v14 = vld [vmem:[%s3408_s2 + $0x194] sm:$0xf0]  ;;  %v1590_v16 = vor.u32 %v2139_v11, %v1589_v10  ;;  %v1637_v17 = vld [vmem:[%s3408_s2 + $0x80] sm:$0xf]  ;;  %v2151_v18 = vld [vmem:[%s3408_s2 + $0x84] sm:$0xf0]  ;;  %v1710_v20 = vor.u32 %v2169_v12, %v1709_v9 }
  0x14   :  { %1021 = vmatpush.bf16.msra.mxu1 %v1662_v55  ;;  %1007 = vmatpush.bf16.msra.mxu0 %v1606_v56  ;;  %v1701_v19 = vld [vmem:[%s3408_s2 + $0x100] sm:$0xf]  ;;  %v1774_v21 = vor.u32 %v2185_v14, %v1773_v13  ;;  %v2167_v22 = vld [vmem:[%s3408_s2 + $0x104] sm:$0xf0]  ;;  %v1581_v23 = vld [vmem:[%s3408_s2 + $0x10] sm:$0xf]  ;;  %v1638_v31 = vor.u32 %v2151_v18, %v1637_v17 }
  0x15   :  { %1034 = vmatpush.bf16.msra.mxu2 %v1726_v59  ;;  %v2137_v24 = vld [vmem:[%s3408_s2 + $0x14] sm:$0xf0]  ;;  %v1765_v25 = vld [vmem:[%s3408_s2 + $0x180] sm:$0xf]  ;;  %v2183_v26 = vld [vmem:[%s3408_s2 + $0x184] sm:$0xf0]  ;;  %v1702_v35 = vor.u32 %v2167_v22, %v1701_v19 }
  0x16   :  { %1047 = vmatpush.bf16.msra.mxu3 %v1790_v60  ;;  %v1949_v27 = vld [vmem:[%s3408_s2 + $0x2f0] sm:$0xf]  ;;  %v2229_v28 = vld [vmem:[%s3408_s2 + $0x2f4] sm:$0xf0]  ;;  %v1582_v34 = vor.u32 %v2137_v24, %v1581_v23  ;;  %v1766_v36 = vor.u32 %v2183_v26, %v1765_v25  ;;  %v1573_v37 = vld [vmem:[%s3408_s2] sm:$0xf] }
  0x17   :  { %v2013_v29 = vld [vmem:[%s3408_s2 + $0x370] sm:$0xf]  ;;  %v2245_v30 = vld [vmem:[%s3408_s2 + $0x374] sm:$0xf0]  ;;  %v2135_v38 = vld [vmem:[%s3408_s2 + $0x4] sm:$0xf0]  ;;  %v1950_v40 = vor.u32 %v2229_v28, %v1949_v27 }
  0x18   :  { %1022 = vmatpush.bf16.msra.mxu1 %v1654_v3  ;;  %1008 = vmatpush.bf16.msra.mxu0 %v1598_v4  ;;  %v2077_v32 = vld [vmem:[%s3408_s2 + $0x3f0] sm:$0xf]  ;;  %v2261_v33 = vld [vmem:[%s3408_s2 + $0x3f4] sm:$0xf0]  ;;  %v2014_v41 = vor.u32 %v2245_v30, %v2013_v29  ;;  %v1941_v42 = vld [vmem:[%s3408_s2 + $0x2e0] sm:$0xf]  ;;  %v1574_v51 = vor.u32 %v2135_v38, %v1573_v37 }
  0x19   :  { %1035 = vmatpush.bf16.msra.mxu2 %v1718_v7  ;;  %v1885_v43 = vld [vmem:[%s3408_s2 + $0x270] sm:$0xf]  ;;  %v2213_v44 = vld [vmem:[%s3408_s2 + $0x274] sm:$0xf0]  ;;  %v2078_v45 = vor.u32 %v2261_v33, %v2077_v32  ;;  %v2227_v46 = vld [vmem:[%s3408_s2 + $0x2e4] sm:$0xf0] }
  0x1a   :  { %1048 = vmatpush.bf16.msra.mxu3 %v1782_v8  ;;  %v2005_v47 = vld [vmem:[%s3408_s2 + $0x360] sm:$0xf]  ;;  %v2243_v48 = vld [vmem:[%s3408_s2 + $0x364] sm:$0xf0]  ;;  %v1886_v52 = vor.u32 %v2213_v44, %v1885_v43  ;;  %v1942_v53 = vor.u32 %v2227_v46, %v1941_v42  ;;  %v1933_v55 = vld [vmem:[%s3408_s2 + $0x2d0] sm:$0xf] }
  0x1b   :  { %v2069_v49 = vld [vmem:[%s3408_s2 + $0x3e0] sm:$0xf]  ;;  %v2259_v50 = vld [vmem:[%s3408_s2 + $0x3e4] sm:$0xf0]  ;;  %v2006_v54 = vor.u32 %v2243_v48, %v2005_v47  ;;  %v2225_v59 = vld [vmem:[%s3408_s2 + $0x2d4] sm:$0xf0] }
  0x1c   :  { %1023 = vmatpush.bf16.msra.mxu1 %v1646_v15  ;;  %1009 = vmatpush.bf16.msra.mxu0 %v1590_v16  ;;  %v1877_v56 = vld [vmem:[%s3408_s2 + $0x260] sm:$0xf]  ;;  %v2211_v57 = vld [vmem:[%s3408_s2 + $0x264] sm:$0xf0]  ;;  %v2070_v58 = vor.u32 %v2259_v50, %v2069_v49  ;;  %v1997_v60 = vld [vmem:[%s3408_s2 + $0x350] sm:$0xf]  ;;  %v1934_v3 = vor.u32 %v2225_v59, %v1933_v55 }
  0x1d   :  { %1036 = vmatpush.bf16.msra.mxu2 %v1710_v20  ;;  %v2241_v61 = vld [vmem:[%s3408_s2 + $0x354] sm:$0xf0]  ;;  %v2061_v62 = vld [vmem:[%s3408_s2 + $0x3d0] sm:$0xf]  ;;  %v1878_v0 = vor.u32 %v2211_v57, %v1877_v56  ;;  %v1925_v1 = vld [vmem:[%s3408_s2 + $0x2c0] sm:$0xf] }
  0x1e   :  { %1049 = vmatpush.bf16.msra.mxu3 %v1774_v21  ;;  %v2257_v63 = vld [vmem:[%s3408_s2 + $0x3d4] sm:$0xf0]  ;;  %v22_v2 = vld [vmem:[%s3406_s0] sm:$0xff]  ;;  %v1998_v4 = vor.u32 %v2241_v61, %v1997_v60  ;;  %v1869_v5 = vld [vmem:[%s3408_s2 + $0x250] sm:$0xf] }
  0x1f   :  { %v2209_v6 = vld [vmem:[%s3408_s2 + $0x254] sm:$0xf0]  ;;  %323 = vst [vmem:[#allocation1] ss:$9 sm:$0xff] %v22_v2  ;;  %v2062_v7 = vor.u32 %v2257_v63, %v2061_v62  ;;  %v2223_v8 = vld [vmem:[%s3408_s2 + $0x2c4] sm:$0xf0] }
  0x20   :  { %1024 = vmatpush.bf16.msra.mxu1 %v1638_v31  ;;  %1010 = vmatpush.bf16.msra.mxu0 %v1582_v34  ;;  %v1989_v9 = vld [vmem:[%s3408_s2 + $0x340] sm:$0xf]  ;;  %v2239_v10 = vld [vmem:[%s3408_s2 + $0x344] sm:$0xf0]  ;;  %v1870_v13 = vor.u32 %v2209_v6, %v1869_v5  ;;  %v1926_v14 = vor.u32 %v2223_v8, %v1925_v1  ;;  %v1917_v16 = vld [vmem:[%s3408_s2 + $0x2b0] sm:$0xf] }
  0x21   :  { %1037 = vmatpush.bf16.msra.mxu2 %v1702_v35  ;;  %v2053_v11 = vld [vmem:[%s3408_s2 + $0x3c0] sm:$0xf]  ;;  %v2255_v12 = vld [vmem:[%s3408_s2 + $0x3c4] sm:$0xf0]  ;;  %v1990_v15 = vor.u32 %v2239_v10, %v1989_v9  ;;  %v2221_v20 = vld [vmem:[%s3408_s2 + $0x2b4] sm:$0xf0] }
  0x22   :  { %1050 = vmatpush.bf16.msra.mxu3 %v1766_v36  ;;  %v1861_v17 = vld [vmem:[%s3408_s2 + $0x240] sm:$0xf]  ;;  %v2207_v18 = vld [vmem:[%s3408_s2 + $0x244] sm:$0xf0]  ;;  %v2054_v19 = vor.u32 %v2255_v12, %v2053_v11  ;;  %v1981_v21 = vld [vmem:[%s3408_s2 + $0x330] sm:$0xf]  ;;  %v1918_v30 = vor.u32 %v2221_v20, %v1917_v16 }
  0x23   :  { %v2237_v22 = vld [vmem:[%s3408_s2 + $0x334] sm:$0xf0]  ;;  %v2045_v23 = vld [vmem:[%s3408_s2 + $0x3b0] sm:$0xf]  ;;  %v1862_v25 = vor.u32 %v2207_v18, %v1861_v17  ;;  %v1909_v26 = vld [vmem:[%s3408_s2 + $0x2a0] sm:$0xf] }
  0x24   :  { %1069 = vmatpush.bf16.msrb.mxu1 %v1950_v40  ;;  %1011 = vmatpush.bf16.msra.mxu0 %v1574_v51  ;;  %v2253_v24 = vld [vmem:[%s3408_s2 + $0x3b4] sm:$0xf0]  ;;  %v1982_v31 = vor.u32 %v2237_v22, %v1981_v21  ;;  %v1853_v32 = vld [vmem:[%s3408_s2 + $0x230] sm:$0xf]  ;;  %v2219_v36 = vld [vmem:[%s3408_s2 + $0x2a4] sm:$0xf0] }
  0x25   :  { %1082 = vmatpush.bf16.msrb.mxu2 %v2014_v41  ;;  %v2205_v33 = vld [vmem:[%s3408_s2 + $0x234] sm:$0xf0]  ;;  %v2046_v35 = vor.u32 %v2253_v24, %v2045_v23  ;;  %v1973_v37 = vld [vmem:[%s3408_s2 + $0x320] sm:$0xf]  ;;  %v2235_v38 = vld [vmem:[%s3408_s2 + $0x324] sm:$0xf0]  ;;  %v1910_v43 = vor.u32 %v2219_v36, %v1909_v26 }
  0x26   :  { %1095 = vmatpush.bf16.msrb.mxu3 %v2078_v45  ;;  %v2679_v27 = vld [vmem:[#allocation1 + $0x12] sm:$0xff]  ;;  %v2681_v28 = vld [vmem:[#allocation1] sm:$0xff]  ;;  %v2683_v29 = vld [vmem:[#allocation1 + $0x9] sm:$0xff]  ;;  %v1854_v42 = vor.u32 %v2205_v33, %v1853_v32  ;;  %v1974_v44 = vor.u32 %v2235_v38, %v1973_v37 }
  0x27   :  { %v2691_v34 = vld [vmem:[#allocation1 + $0x1b] sm:$0xff]  ;;  %1038 = vmatmul.bf16.vlgmr.msra.gmra.mxu2 %v2679_v27  ;;  %v2251_v41 = vld [vmem:[%s3408_s2 + $0x3a4] sm:$0xf0]  ;;  %1012 = vmatmul.bf16.vlgmr.msra.gmra.mxu0 %v2681_v28  ;;  %v1901_v45 = vld [vmem:[%s3408_s2 + $0x290] sm:$0xf] }
  0x28   :  { %1056 = vmatpush.bf16.msrb.mxu0 %v1886_v52  ;;  %1070 = vmatpush.bf16.msrb.mxu1 %v1942_v53  ;;  %v2037_v40 = vld [vmem:[%s3408_s2 + $0x3a0] sm:$0xf]  ;;  %v2203_v47 = vld [vmem:[%s3408_s2 + $0x224] sm:$0xf0]  ;;  %v2217_v49 = vld [vmem:[%s3408_s2 + $0x294] sm:$0xf0] }
  0x29   :  { %1083 = vmatpush.bf16.msrb.mxu2 %v2006_v54  ;;  %1025 = vmatmul.bf16.vlgmr.msra.gmra.mxu1 %v2683_v29  ;;  %v1845_v46 = vld [vmem:[%s3408_s2 + $0x220] sm:$0xf]  ;;  %v2038_v48 = vor.u32 %v2251_v41, %v2037_v40  ;;  %v1965_v50 = vld [vmem:[%s3408_s2 + $0x310] sm:$0xf]  ;;  %v2233_v51 = vld [vmem:[%s3408_s2 + $0x314] sm:$0xf0]  ;;  %v1902_v59 = vor.u32 %v2217_v49, %v1901_v45 }
  0x2a   :  { %1096 = vmatpush.bf16.msrb.mxu3 %v2070_v58  ;;  %v2029_v52 = vld [vmem:[%s3408_s2 + $0x390] sm:$0xf]  ;;  %v2249_v53 = vld [vmem:[%s3408_s2 + $0x394] sm:$0xf0]  ;;  %v1846_v54 = vor.u32 %v2203_v47, %v1845_v46  ;;  %v1893_v55 = vld [vmem:[%s3408_s2 + $0x280] sm:$0xf]  ;;  %v1966_v60 = vor.u32 %v2233_v51, %v1965_v50 }
  0x2b   :  { %1051 = vmatmul.bf16.vlgmr.msra.gmra.mxu3 %v2691_v34  ;;  %v2215_v56 = vld [vmem:[%s3408_s2 + $0x284] sm:$0xf0]  ;;  %v1957_v57 = vld [vmem:[%s3408_s2 + $0x300] sm:$0xf]  ;;  %v1837_v63 = vld [vmem:[%s3408_s2 + $0x210] sm:$0xf]  ;;  %v2030_v1 = vor.u32 %v2249_v53, %v2029_v52 }
  0x2c   :  { %1057 = vmatpush.bf16.msrb.mxu0 %v1878_v0  ;;  %1071 = vmatpush.bf16.msrb.mxu1 %v1934_v3  ;;  %v2231_v58 = vld [vmem:[%s3408_s2 + $0x304] sm:$0xf0]  ;;  %v2021_v61 = vld [vmem:[%s3408_s2 + $0x380] sm:$0xf]  ;;  %v2201_v0 = vld [vmem:[%s3408_s2 + $0x214] sm:$0xf0] }
  0x2d   :  { %1084 = vmatpush.bf16.msrb.mxu2 %v1998_v4  ;;  %v2247_v62 = vld [vmem:[%s3408_s2 + $0x384] sm:$0xf0]  ;;  %v2148_v2 = vld [vmem:[%s3408_s2 + $0x74] sm:$0xf]  ;;  %v2085_v3 = vld [vmem:[%s3408_s2 + $0x400] sm:$0xf]  ;;  %v1838_v12 = vor.u32 %v2201_v0, %v1837_v63 }
  0x2e   :  { %1097 = vmatpush.bf16.msrb.mxu3 %v2062_v7  ;;  %v2263_v4 = vld [vmem:[%s3408_s2 + $0x404] sm:$0x70]  ;;  %v1631_v5 = vld [vmem:[%s3408_s2 + $0x78] sm:$0xf0]  ;;  %v2164_v6 = vld [vmem:[%s3408_s2 + $0xf4] sm:$0xf]  ;;  %v2022_v18 = vor.u32 %v2247_v62, %v2021_v61 }
  0x2f   :  { %v2322_v7 = vmov 65535   ;;  %v1695_v9 = vld [vmem:[%s3408_s2 + $0xf8] sm:$0xf0]  ;;  %v2180_v10 = vld [vmem:[%s3408_s2 + $0x174] sm:$0xf]  ;;  %v2086_v17 = vor.u32 %v2263_v4, %v2085_v3 }
  0x30   :  { %1058 = vmatpush.bf16.msrb.mxu0 %v1870_v13  ;;  %1072 = vmatpush.bf16.msrb.mxu1 %v1926_v14  ;;  %v996_v8 = vsel %vm994_vm0, 4294967295, %v2322_v7  ;;  %v1759_v11 = vld [vmem:[%s3408_s2 + $0x178] sm:$0xf0]  ;;  %v1894_v13 = vor.u32 %v2215_v56, %v1893_v55  ;;  %v1958_v14 = vor.u32 %v2231_v58, %v1957_v57  ;;  %v2199_v16 = vld [vmem:[%s3408_s2 + $0x204] sm:$0xf0]  ;;  %v1698_v21 = vor.u32 %v2164_v6, %v1695_v9  ;;  %v2842_v49 = vld [vmem:[#allocation1 + $0x2d] sm:$0xff] }
  0x31   :  { %1085 = vmatpush.bf16.msrb.mxu2 %v1990_v15  ;;  %v1829_v15 = vld [vmem:[%s3408_s2 + $0x200] sm:$0xf]  ;;  %v2792_v20 = vsel %vm995_vm1, %v996_v8, 0  ;;  %v1762_v22 = vor.u32 %v2180_v10, %v1759_v11  ;;  %v2146_v23 = vld [vmem:[%s3408_s2 + $0x64] sm:$0xf]  ;;  %v2819_v37 = vld [vmem:[#allocation1 + $0x36] sm:$0xff] }
  0x32   :  { %1098 = vmatpush.bf16.msrb.mxu3 %v2054_v19  ;;  %v1634_v19 = vor.u32 %v2148_v2, %v1631_v5  ;;  %v1623_v24 = vld [vmem:[%s3408_s2 + $0x68] sm:$0xf0]  ;;  %v1830_v32 = vor.u32 %v2199_v16, %v1829_v15  ;;  %v2144_v33 = vld [vmem:[%s3408_s2 + $0x54] sm:$0xf]  ;;  %v999_v36 = vand.u32 %v2086_v17, %v2792_v20  ;;  %v1679_v41 = vld [vmem:[%s3408_s2 + $0xd8] sm:$0xf0] }
  0x33   :  { %v1687_v26 = vld [vmem:[%s3408_s2 + $0xe8] sm:$0xf0]  ;;  %v1626_v38 = vor.u32 %v2146_v23, %v1623_v24  ;;  %v2160_v40 = vld [vmem:[%s3408_s2 + $0xd4] sm:$0xf]  ;;  %v1743_v47 = vld [vmem:[%s3408_s2 + $0x158] sm:$0xf0] }
  0x34   :  { %1059 = vmatpush.bf16.msrb.mxu0 %v1862_v25  ;;  %1073 = vmatpush.bf16.msrb.mxu1 %v1918_v30  ;;  %v2162_v25 = vld [vmem:[%s3408_s2 + $0xe4] sm:$0xf]  ;;  %v2176_v46 = vld [vmem:[%s3408_s2 + $0x154] sm:$0xf]  ;;  %v23_v50 = vld [vmem:[%s3406_s0 + $0x8] sm:$0x1]  ;;  %v1682_v56 = vor.u32 %v2160_v40, %v1679_v41 }
  0x35   :  { %1086 = vmatpush.bf16.msrb.mxu2 %v1982_v31  ;;  %v2178_v30 = vld [vmem:[%s3408_s2 + $0x164] sm:$0xf]  ;;  %v1751_v31 = vld [vmem:[%s3408_s2 + $0x168] sm:$0xf0]  ;;  %v1746_v57 = vor.u32 %v2176_v46, %v1743_v47  ;;  %v2140_v2 = vld [vmem:[%s3408_s2 + $0x34] sm:$0xf] }
  0x36   :  { %1099 = vmatpush.bf16.msrb.mxu3 %v2046_v35  ;;  %v1615_v35 = vld [vmem:[%s3408_s2 + $0x58] sm:$0xf0]  ;;  %v1754_v45 = vor.u32 %v2178_v30, %v1751_v31  ;;  %v1815_v55 = vld [vmem:[%s3408_s2 + $0x1e8] sm:$0xf0]  ;;  %v2142_v58 = vld [vmem:[%s3408_s2 + $0x44] sm:$0xf] }
  0x37   :  { %v2847_v51 = vld [vmem:[#allocation1 + $0x3f] sm:$0xff]  ;;  %v1618_v53 = vor.u32 %v2144_v33, %v1615_v35  ;;  %v1671_v61 = vld [vmem:[%s3408_s2 + $0xc8] sm:$0xf0]  ;;  %v2192_v3 = vld [vmem:[%s3408_s2 + $0x1d4] sm:$0xf]  ;;  %v2323_v15 = vmov 64  }
  0x38   :  { %1060 = vmatpush.bf16.msrb.mxu0 %v1854_v42  ;;  %1074 = vmatpush.bf16.msrb.mxu1 %v1910_v43  ;;  %v2196_v42 = vld [vmem:[%s3408_s2 + $0x1f4] sm:$0xf]  ;;  %v1823_v43 = vld [vmem:[%s3408_s2 + $0x1f8] sm:$0xf0]  ;;  %v2174_v62 = vld [vmem:[%s3408_s2 + $0x144] sm:$0xf] }
  0x39   :  { %1087 = vmatpush.bf16.msrb.mxu2 %v1974_v44  ;;  %v1690_v44 = vor.u32 %v2162_v25, %v1687_v26  ;;  %v1826_v52 = vor.u32 %v2196_v42, %v1823_v43  ;;  %v1735_v63 = vld [vmem:[%s3408_s2 + $0x148] sm:$0xf0]  ;;  %v1807_v4 = vld [vmem:[%s3408_s2 + $0x1d8] sm:$0xf0]  ;;  %v2156_v8 = vld [vmem:[%s3408_s2 + $0xb4] sm:$0xf]  ;;  %2285 = vset.pattern.permute.xlu0 %v2323_v15 }
  0x3a   :  { %1100 = vmatpush.bf16.msrb.mxu3 %v2038_v48  ;;  %v2839_v48 = vld [vmem:[#allocation1 + $0x24] sm:$0xff]  ;;  %v1738_v6 = vor.u32 %v2174_v62, %v1735_v63  ;;  %v1599_v7 = vld [vmem:[%s3408_s2 + $0x38] sm:$0xf0]  ;;  %v2172_v10 = vld [vmem:[%s3408_s2 + $0x134] sm:$0xf]  ;;  %2286 = vset.pattern.permute.xlu1 %v2323_v15 }
  0x3b   :  { %333 = vst [vmem:[#allocation1] ss:$9 sm:$0xff] %v23_v50  ;;  %v1663_v9 = vld [vmem:[%s3408_s2 + $0xb8] sm:$0xf0]  ;;  %v2909_v16 = vld [vmem:[%s3407_s1] sm:$0x3]  ;;  %v1602_v17 = vor.u32 %v2140_v2, %v1599_v7 }
  0x3c   :  { %1061 = vmatpush.bf16.msrb.mxu0 %v1846_v54  ;;  %1075 = vmatpush.bf16.msrb.mxu1 %v1902_v59  ;;  %v2194_v54 = vld [vmem:[%s3408_s2 + $0x1e4] sm:$0xf]  ;;  %v1607_v59 = vld [vmem:[%s3408_s2 + $0x48] sm:$0xf0]  ;;  %v1727_v11 = vld [vmem:[%s3408_s2 + $0x138] sm:$0xf0]  ;;  %v1666_v26 = vor.u32 %v2156_v8, %v1663_v9 }
  0x3d   :  { %1088 = vmatpush.bf16.msrb.mxu2 %v1966_v60  ;;  %v2158_v60 = vld [vmem:[%s3408_s2 + $0xc4] sm:$0xf]  ;;  %v1818_v0 = vor.u32 %v2194_v54, %v1815_v55  ;;  %v1799_v24 = vld [vmem:[%s3408_s2 + $0x1c8] sm:$0xf0]  ;;  %v158_v25 = vand.u32 2139095040, %v2909_v16  ;;  %v1730_v30 = vor.u32 %v2172_v10, %v1727_v11 }
  0x3e   :  { %1101 = vmatpush.bf16.msrb.mxu3 %v2030_v1  ;;  %v1610_v1 = vor.u32 %v2142_v58, %v1607_v59  ;;  %v1674_v5 = vor.u32 %v2158_v60, %v1671_v61  ;;  %v2190_v23 = vld [vmem:[%s3408_s2 + $0x1c4] sm:$0xf]  ;;  %v2136_v31 = vld [vmem:[%s3408_s2 + $0x14] sm:$0xf] }
  0x40   :  { %1062 = vmatpush.bf16.msrb.mxu0 %v1838_v12  ;;  %1076 = vmatpush.bf16.msrb.mxu1 %v1894_v13  ;;  %v1810_v12 = vor.u32 %v2192_v3, %v1807_v4  ;;  %v2138_v13 = vld [vmem:[%s3408_s2 + $0x24] sm:$0xf] }
  0x41   :  { %1089 = vmatpush.bf16.msrb.mxu2 %v1958_v14  ;;  %v1591_v14 = vld [vmem:[%s3408_s2 + $0x28] sm:$0xf0] }
  0x42   :  { %1102 = vmatpush.bf16.msrb.mxu3 %v2022_v18  ;;  %v2154_v18 = vld [vmem:[%s3408_s2 + $0xa4] sm:$0xf] }
  0x43   :  { %1077 = vmatmul.bf16.vlgmr.msrb.gmra.mxu1 %v2842_v49 }
  0x44   :  { %1121 = vmatpush.bf16.msra.mxu1 %v1634_v19  ;;  %1063 = vmatpush.bf16.msrb.mxu0 %v1830_v32  ;;  %v1655_v19 = vld [vmem:[%s3408_s2 + $0xa8] sm:$0xf0]  ;;  %v1583_v32 = vld [vmem:[%s3408_s2 + $0x18] sm:$0xf0] }
  0x45   :  { %1134 = vmatpush.bf16.msra.mxu2 %v1698_v21  ;;  %1103 = vmatmul.bf16.vlgmr.msrb.gmra.mxu3 %v2847_v51  ;;  %v2170_v21 = vld [vmem:[%s3408_s2 + $0x124] sm:$0xf] }
  0x46   :  { %1147 = vmatpush.bf16.msra.mxu3 %v1762_v22  ;;  %1090 = vmatmul.bf16.vlgmr.msrb.gmra.mxu2 %v2819_v37  ;;  %v1719_v22 = vld [vmem:[%s3408_s2 + $0x128] sm:$0xf0] }
  0x47   :  { %1064 = vmatmul.bf16.vlgmr.msrb.gmra.mxu0 %v2839_v48 }
  0x48   :  { %1115 = vmatpush.bf16.msra.mxu0 %v999_v36  ;;  %1122 = vmatpush.bf16.msra.mxu1 %v1626_v38 }
  0x49   :  { %1135 = vmatpush.bf16.msra.mxu2 %v1690_v44 }
  0x4a   :  { %1148 = vmatpush.bf16.msra.mxu3 %v1754_v45 }
  0x4c   :  { %1160 = vmatpush.bf16.msrb.mxu0 %v1826_v52  ;;  %1123 = vmatpush.bf16.msra.mxu1 %v1618_v53 }
  0x4d   :  { %1136 = vmatpush.bf16.msra.mxu2 %v1682_v56 }
  0x4e   :  { %1149 = vmatpush.bf16.msra.mxu3 %v1746_v57 }
  0x50   :  { %1161 = vmatpush.bf16.msrb.mxu0 %v1818_v0  ;;  %1124 = vmatpush.bf16.msra.mxu1 %v1610_v1 }
  0x51   :  { %1137 = vmatpush.bf16.msra.mxu2 %v1674_v5 }
  0x52   :  { %1150 = vmatpush.bf16.msra.mxu3 %v1738_v6 }
  0x53   :  { %10 = vsyncpa [#allocation3], 0  ;;  %v2939_v33 = vld [vmem:[%s3408_s2 + $0x94] sm:$0xf]  ;;  %v1647_v35 = vld [vmem:[%s3408_s2 + $0x98] sm:$0xf0]  ;;  %v1802_v43 = vor.u32 %v2190_v23, %v1799_v24  ;;  %v1594_v46 = vor.u32 %v2138_v13, %v1591_v14  ;;  %v1658_v53 = vor.u32 %v2154_v18, %v1655_v19  ;;  %v1722_v54 = vor.u32 %v2170_v21, %v1719_v22 }
  0x54   :  { %v2168_v36 = vld [vmem:[%s3408_s2 + $0x114] sm:$0xf]  ;;  %v1711_v38 = vld [vmem:[%s3408_s2 + $0x118] sm:$0xf0]  ;;  %v159_v42 = vshrl.u32 %v158_v25, 23  ;;  %1162 = vmatpush.bf16.msrb.mxu0 %v1810_v12  ;;  %1125 = vmatpush.bf16.msra.mxu1 %v1602_v17  ;;  %v1586_v58 = vor.u32 %v2136_v31, %v1583_v32  ;;  %v1650_v62 = vor.u32 %v2939_v33, %v1647_v35  ;;  %vm157_vm14 = vcmp.lt.s32.totalorder %v2909_v16, 0 }
  0x55   :  { %v2188_v40 = vld [vmem:[%s3408_s2 + $0x1b4] sm:$0xf]  ;;  %v1791_v41 = vld [vmem:[%s3408_s2 + $0x1b8] sm:$0xf0]  ;;  %v2959_v44 = vld [vmem:[%s3408_s2 + $0x4] sm:$0xf]  ;;  %1138 = vmatpush.bf16.msra.mxu2 %v1666_v26  ;;  %v1714_v63 = vor.u32 %v2168_v36, %v1711_v38 }
  0x56   :  { %v155_v45 = vand.u32 2147483647, %v2909_v16  ;;  %v2965_v47 = vld [vmem:[%s3408_s2 + $0x8] sm:$0xf0]  ;;  %v2970_v50 = vld [vmem:[%s3408_s2 + $0x84] sm:$0xf]  ;;  %1151 = vmatpush.bf16.msra.mxu3 %v1730_v30  ;;  %v1794_v0 = vor.u32 %v2188_v40, %v1791_v41 }
  0x57   :  { %v1568_v52 = vadd.s32 4294967169, %v159_v42  ;;  %v2975_v55 = vld [vmem:[%s3408_s2 + $0x88] sm:$0xf0]  ;;  %v2980_v56 = vld [vmem:[%s3408_s2 + $0x104] sm:$0xf]  ;;  %v1578_v4 = vor.u32 %v2959_v44, %v2965_v47  ;;  %vm991_vm0 = vcmask 105472  }
  0x58   :  { %v2985_v57 = vld [vmem:[%s3408_s2 + $0x108] sm:$0xf0]  ;;  %v2990_v59 = vld [vmem:[%s3408_s2 + $0x274] sm:$0xf]  ;;  %v2995_v60 = vld [vmem:[%s3408_s2 + $0x278] sm:$0xf0]  ;;  %1163 = vmatpush.bf16.msrb.mxu0 %v1802_v43  ;;  %1126 = vmatpush.bf16.msra.mxu1 %v1594_v46  ;;  %v1642_v5 = vor.u32 %v2970_v50, %v2975_v55 }
  0x59   :  { %v165_v61 = vadd.s32 1, %v1568_v52  ;;  %v3001_v1 = vld [vmem:[%s3408_s2 + $0x2f4] sm:$0xf]  ;;  %v3006_v2 = vld [vmem:[%s3408_s2 + $0x2f8] sm:$0xf0]  ;;  %v1706_v6 = vor.u32 %v2980_v56, %v2985_v57  ;;  %1139 = vmatpush.bf16.msra.mxu2 %v1658_v53  ;;  %v1890_v11 = vor.u32 %v2990_v59, %v2995_v60  ;;  %s2331_s28 = smov 64  }
  0x5a   :  { %v162_v3 = vand.u32 8388607, %v155_v45  ;;  %v3019_v7 = vld [vmem:[%s3408_s2 + $0x374] sm:$0xf]  ;;  %v3024_v8 = vld [vmem:[%s3408_s2 + $0x378] sm:$0xf0]  ;;  %1152 = vmatpush.bf16.msra.mxu3 %v1722_v54  ;;  %v1954_v14 = vor.u32 %v3001_v1, %v3006_v2 }
  0x5b   :  { %v2186_v9 = vld [vmem:[%s3408_s2 + $0x1a4] sm:$0xf]  ;;  %v1783_v10 = vld [vmem:[%s3408_s2 + $0x1a8] sm:$0xf0]  ;;  %vm166_vm2 = vcmp.gt.s32.totalorder %v165_v61, 0  ;;  %v2018_v32 = vor.u32 %v3019_v7, %v3024_v8  ;;  %s1559_s0 = sshll.u32 %s3411_s5, 4  ;;  %s1560_s0 = int_to_ptr.hbm [resolvable:$true] %s1559_s0 }
  0x5c   :  { %v2184_v12 = vld [vmem:[%s3408_s2 + $0x194] sm:$0xf]  ;;  %v167_v13 = vsel %vm166_vm2, %v165_v61, 0  ;;  %1164 = vmatpush.bf16.msrb.mxu0 %v1794_v0  ;;  %v1786_v17 = vor.u32 %v2186_v9, %v1783_v10  ;;  %v1775_v18 = vld [vmem:[%s3408_s2 + $0x198] sm:$0xf0]  ;;  %v163_v19 = vor.u32 8388608, %v162_v3  ;;  %1127 = vmatpush.bf16.msra.mxu1 %v1586_v58 }
  0x5d   :  { %v169_v15 = vand.u32 31, %v167_v13  ;;  %v3042_v21 = vshrl.u32 %v167_v13, 5  ;;  %v2324_v23 = vmov 683565275   ;;  %v2325_v25 = vmov 2475754826   ;;  %1140 = vmatpush.bf16.msra.mxu2 %v1650_v62 }
  0x5e   :  { %v2326_v30 = vmov 2131351028   ;;  %1153 = vmatpush.bf16.msra.mxu3 %v1714_v63  ;;  %v2327_v33 = vmov 2102212464   ;;  %v2328_v36 = vmov 920167782   ;;  %v1778_v42 = vor.u32 %v2184_v12, %v1775_v18 }
  0x5f   :  { %v3044_v22 = vsub.s32 32, %v169_v15  ;;  %v172_v24 = vshll.u32 %v2324_v23, %v169_v15  ;;  %v175_v26 = vshll.u32 %v2325_v25, %v169_v15  ;;  %v178_v31 = vshll.u32 %v2326_v30, %v169_v15  ;;  %v2210_v40 = vld [vmem:[%s3408_s2 + $0x264] sm:$0xf]  ;;  %v1879_v41 = vld [vmem:[%s3408_s2 + $0x268] sm:$0xf0] }
  0x60   :  { %v181_v35 = vshll.u32 %v2327_v33, %v169_v15  ;;  %v184_v38 = vshll.u32 %v2328_v36, %v169_v15  ;;  %1165 = vmatpush.bf16.msrb.mxu0 %v1786_v17  ;;  %v2226_v47 = vld [vmem:[%s3408_s2 + $0x2e4] sm:$0xf]  ;;  %v1943_v50 = vld [vmem:[%s3408_s2 + $0x2e8] sm:$0xf0]  ;;  %v2329_v53 = vmov 1326507024   ;;  %1128 = vmatpush.bf16.msra.mxu1 %v1578_v4  ;;  %v1882_v61 = vor.u32 %v2210_v40, %v1879_v41 }
  0x61   :  { %v173_v43 = vshrl.u32 %v2325_v25, %v3044_v22  ;;  %v176_v44 = vshrl.u32 %v2326_v30, %v3044_v22  ;;  %v179_v46 = vshrl.u32 %v2327_v33, %v3044_v22  ;;  %v182_v52 = vshrl.u32 %v2328_v36, %v3044_v22  ;;  %v2242_v56 = vld [vmem:[%s3408_s2 + $0x364] sm:$0xf]  ;;  %v2007_v57 = vld [vmem:[%s3408_s2 + $0x368] sm:$0xf0]  ;;  %1141 = vmatpush.bf16.msra.mxu2 %v1642_v5 }
  0x62   :  { %v185_v54 = vshrl.u32 %v2329_v53, %v3044_v22  ;;  %vm187_vm3 = vcmp.lt.s32.totalorder %v3042_v21, 1  ;;  %v3067_v55 = vshll.u32 %v163_v19, 8  ;;  %vm190_vm4 = vcmp.lt.s32.totalorder %v3042_v21, 4  ;;  %1154 = vmatpush.bf16.msra.mxu3 %v1706_v6 }
  0x63   :  { %v174_v58 = vor.u32 %v173_v43, %v172_v24  ;;  %v3075_v59 = vor.u32 %v176_v44, %v175_v26  ;;  %v180_v60 = vor.u32 %v179_v46, %v178_v31  ;;  %v183_v62 = vor.u32 %v182_v52, %v181_v35  ;;  %1129 = vmatmul.bf16.vlgmr.msra.gmra.mxu1 %v2681_v28 }
  0x64   :  { %v186_v63 = vor.u32 %v185_v54, %v184_v38  ;;  %vm189_vm5 = vcmp.lt.s32.totalorder %v3042_v21, 3  ;;  %1173 = vmatpush.bf16.msrb.mxu1 %v1890_v11  ;;  %v1946_v0 = vor.u32 %v2226_v47, %v1943_v50  ;;  %vm188_vm6 = vcmp.lt.s32.totalorder %v3042_v21, 2  ;;  %1166 = vmatpush.bf16.msrb.mxu0 %v1778_v42 }
  0x65   :  { %1186 = vmatpush.bf16.msrb.mxu2 %v1954_v14  ;;  %v195_v1 = vsel %vm187_vm3, %v174_v58, %v3075_v59  ;;  %v199_v2 = vsel %vm187_vm3, %v3075_v59, %v180_v60  ;;  %v2010_v3 = vor.u32 %v2242_v56, %v2007_v57  ;;  %v196_v4 = vsel %vm190_vm4, %v183_v62, 920167782  ;;  %1155 = vmatmul.bf16.vlgmr.msra.gmra.mxu3 %v2679_v27 }
  0x66   :  { %1199 = vmatpush.bf16.msrb.mxu3 %v2018_v32  ;;  %v200_v5 = vsel %vm190_vm4, %v186_v63, 1326507024  ;;  %v197_v6 = vsel %vm189_vm5, %v180_v60, %v196_v4  ;;  %v204_v8 = vand.u32 65535, %v3067_v55  ;;  %v205_v9 = vshrl.u32 %v3067_v55, 16  ;;  %1142 = vmatmul.bf16.vlgmr.msra.gmra.mxu2 %v2683_v29 }
  0x67   :  { %v201_v7 = vsel %vm189_vm5, %v183_v62, %v200_v5  ;;  %v198_v10 = vsel %vm188_vm6, %v195_v1, %v197_v6  ;;  %v171_v29 = vshrl.u32 %v2324_v23, %v3044_v22  ;;  %v192_v22 = vsel %vm190_vm4, %v180_v60, 2102212464 }
  0x68   :  { %v202_v11 = vsel %vm188_vm6, %v199_v2, %v201_v7  ;;  %1174 = vmatpush.bf16.msrb.mxu1 %v1882_v61  ;;  %v228_v14 = vand.u32 65535, %v198_v10  ;;  %v229_v15 = vshrl.u32 %v198_v10, 16  ;;  %v2330_v23 = vmov 0  }
  0x69   :  { %1187 = vmatpush.bf16.msrb.mxu2 %v1946_v0  ;;  %v206_v12 = vand.u32 65535, %v202_v11  ;;  %v207_v13 = vshrl.u32 %v202_v11, 16  ;;  %v191_v35 = vsel %vm187_vm3, %v171_v29, %v174_v58  ;;  %v193_v50 = vsel %vm189_vm5, %v3075_v59, %v192_v22 }
  0x6a   :  { %1200 = vmatpush.bf16.msrb.mxu3 %v2010_v3  ;;  %v230_v19 = vmul.u32 %v228_v14, %v204_v8  ;;  %v231_v24 = vmul.u32 %v229_v15, %v204_v8  ;;  %v232_v25 = vmul.u32 %v228_v14, %v205_v9  ;;  %v233_v27 = vmul.u32 %v229_v15, %v205_v9 }
  0x6b   :  { %v208_v17 = vmul.u32 %v206_v12, %v204_v8  ;;  %v209_v28 = vmul.u32 %v207_v13, %v204_v8  ;;  %v210_v18 = vmul.u32 %v206_v12, %v205_v9  ;;  %v211_v26 = vmul.u32 %v207_v13, %v205_v9 }
  0x6c   :  { %v234_v32 = vshll.u32 %v231_v24, 16  ;;  %v236_v33 = vshll.u32 %v232_v25, 16  ;;  %v235_v46 = vshrl.u32 %v231_v24, 16  ;;  %v237_v56 = vshrl.u32 %v232_v25, 16 }
  0x6d   :  { %v212_v30 = vshll.u32 %v209_v28, 16  ;;  %v214_v31 = vshll.u32 %v210_v18, 16  ;;  %v213_v41 = vshrl.u32 %v209_v28, 16  ;;  %v215_v52 = vshrl.u32 %v210_v18, 16  ;;  %v2208_v28 = vld [vmem:[%s3408_s2 + $0x254] sm:$0xf] }
  0x6e   :  { %vm238_vm8 = vc.u32 %v230_v19, %v234_v32  ;;  %v240_v40 = vadd.s32 %v234_v32, %v230_v19  ;;  %v194_v61 = vsel %vm188_vm6, %v191_v35, %v193_v50  ;;  %vm3118_vm15 = vcmp.le.f32.partialorder %v155_v45, 0.7853982  ;;  %v1871_v18 = vld [vmem:[%s3408_s2 + $0x258] sm:$0xf0]  ;;  %v2224_v19 = vld [vmem:[%s3408_s2 + $0x2d4] sm:$0xf] }
  0x6f   :  { %vm216_vm7 = vc.u32 %v208_v17, %v212_v30  ;;  %v218_v36 = vadd.s32 %v212_v30, %v208_v17  ;;  %v239_v43 = vsel %vm238_vm8, 1, %v2330_v23  ;;  %v248_v1 = vmul.u32 %v3067_v55, %v194_v61  ;;  %v1935_v45 = vld [vmem:[%s3408_s2 + $0x2d8] sm:$0xf0]  ;;  %v2182_v35 = vld [vmem:[%s3408_s2 + $0x184] sm:$0xf] }
  0x70   :  { %v217_v38 = vsel %vm216_vm7, 1, %v2330_v23  ;;  %v241_v47 = vadd.s32 %v239_v43, %v233_v27  ;;  %vm242_vm10 = vc.u32 %v240_v40, %v236_v33  ;;  %v244_v60 = vadd.s32 %v240_v40, %v236_v33  ;;  %v1999_v32 = vld [vmem:[%s3408_s2 + $0x358] sm:$0xf0]  ;;  %v3140_v33 = vld [vmem:[#allocation1] sm:$0xff]  ;;  %v2260_v40 = vld [vmem:[%s3408_s2 + $0x3f4] sm:$0xf] }
  0x71   :  { %v219_v42 = vadd.s32 %v217_v38, %v211_v26  ;;  %vm220_vm9 = vc.u32 %v218_v36, %v214_v31  ;;  %v243_v54 = vsel %vm242_vm10, 1, %v2330_v23  ;;  %v1874_v30 = vor.u32 %v2208_v28, %v1871_v18  ;;  %v2240_v31 = vld [vmem:[%s3408_s2 + $0x354] sm:$0xf]  ;;  %2091 = vmatmul.msk.bf16.vlgmr.msra.gmra.mxu0 %vm991_vm0, %v3140_v33  ;;  %v1767_v38 = vld [vmem:[%s3408_s2 + $0x188] sm:$0xf0] }
  0x72   :  { %v221_v44 = vsel %vm220_vm9, 1, %v2330_v23  ;;  %v245_v57 = vadd.s32 %v243_v54, %v241_v47  ;;  %v1938_v27 = vor.u32 %v2224_v19, %v1935_v45  ;;  %v2002_v23 = vor.u32 %v2240_v31, %v1999_v32  ;;  %v2206_v43 = vld [vmem:[%s3408_s2 + $0x244] sm:$0xf]  ;;  %v1975_v45 = vld [vmem:[%s3408_s2 + $0x328] sm:$0xf0] }
  0x73   :  { %v223_v53 = vadd.s32 %v221_v44, %v219_v42  ;;  %1175 = vmatpush.bf16.msrb.mxu1 %v1874_v30  ;;  %v2079_v42 = vld [vmem:[%s3408_s2 + $0x3f8] sm:$0xf0]  ;;  %v1863_v44 = vld [vmem:[%s3408_s2 + $0x248] sm:$0xf0]  ;;  %v2218_v19 = vld [vmem:[%s3408_s2 + $0x2a4] sm:$0xf]  ;;  %vm298_vm7 = vweird.f32 %v2909_v16 }
  0x74   :  { %v246_v62 = vadd.s32 %v245_v57, %v235_v46  ;;  %1188 = vmatpush.bf16.msrb.mxu2 %v1938_v27  ;;  %1201 = vmatpush.bf16.msrb.mxu3 %v2002_v23  ;;  %v2082_v47 = vor.u32 %v2260_v40, %v2079_v42  ;;  %v1866_v50 = vor.u32 %v2206_v43, %v1863_v44  ;;  %v2238_v57 = vld [vmem:[%s3408_s2 + $0x344] sm:$0xf]  ;;  %v2055_v27 = vld [vmem:[%s3408_s2 + $0x3c8] sm:$0xf0]  ;;  %v1903_v23 = vld [vmem:[%s3408_s2 + $0x298] sm:$0xf0] }
  0x75   :  { %v224_v58 = vadd.s32 %v223_v53, %v213_v41  ;;  %v1770_v41 = vor.u32 %v2182_v35, %v1767_v38  ;;  %v1927_v53 = vld [vmem:[%s3408_s2 + $0x2c8] sm:$0xf0]  ;;  %v2254_v31 = vld [vmem:[%s3408_s2 + $0x3c4] sm:$0xf]  ;;  %v2200_v35 = vld [vmem:[%s3408_s2 + $0x214] sm:$0xf] }
  0x76   :  { %v247_v0 = vadd.s32 %v246_v62, %v237_v56  ;;  %v2232_v38 = vld [vmem:[%s3408_s2 + $0x314] sm:$0xf]  ;;  %v1967_v40 = vld [vmem:[%s3408_s2 + $0x318] sm:$0xf0]  ;;  %v2058_v43 = vor.u32 %v2254_v31, %v2055_v27  ;;  %vm1481_vm8 = vcmask 523264  }
  0x77   :  { %v225_v63 = vadd.s32 %v224_v58, %v215_v52  ;;  %v2222_v52 = vld [vmem:[%s3408_s2 + $0x2c4] sm:$0xf]  ;;  %1167 = vmatpush.bf16.msrb.mxu0 %v1770_v41  ;;  %v1991_v58 = vld [vmem:[%s3408_s2 + $0x348] sm:$0xf0]  ;;  %1176 = vmatpush.bf16.msrb.mxu1 %v1866_v50 }
  0x78   :  { %v251_v2 = vadd.s32 1, %v247_v0  ;;  %v1930_v56 = vor.u32 %v2222_v52, %v1927_v53  ;;  %v2047_v52 = vld [vmem:[%s3408_s2 + $0x3b8] sm:$0xf0]  ;;  %v2198_v53 = vld [vmem:[%s3408_s2 + $0x204] sm:$0xf] }
  0x79   :  { %vm250_vm11 = vc.u32 %v225_v63, %v244_v60  ;;  %v249_v21 = vadd.s32 %v244_v60, %v225_v63  ;;  %v2258_v60 = vld [vmem:[%s3408_s2 + $0x3e4] sm:$0xf]  ;;  %v1994_v63 = vor.u32 %v2238_v57, %v1991_v58  ;;  %v1970_v57 = vor.u32 %v2232_v38, %v1967_v40  ;;  %v1831_v58 = vld [vmem:[%s3408_s2 + $0x208] sm:$0xf0] }
  0x7a   :  { %v252_v3 = vsel %vm250_vm11, %v251_v2, %v247_v0  ;;  %v2071_v0 = vld [vmem:[%s3408_s2 + $0x3e8] sm:$0xf0]  ;;  %v1855_v2 = vld [vmem:[%s3408_s2 + $0x238] sm:$0xf0]  ;;  %1189 = vmatpush.bf16.msrb.mxu2 %v1930_v56 }
  0x7b   :  { %v253_v4 = vadd.s32 %v252_v3, %v248_v1  ;;  %1212 = vmatpush.bf16.msra.mxu0 %v2082_v47  ;;  %v2204_v1 = vld [vmem:[%s3408_s2 + $0x234] sm:$0xf]  ;;  %v2294_v3 = vld [vmem:[%s3407_s1] sm:$0x3]  ;;  %1202 = vmatpush.bf16.msrb.mxu3 %v1994_v63 }
  0x7d   :  { %v254_v59 = vadd.s32 536870912, %v253_v4 }
  0x7f   :  { %v255_v5 = vshrl.u32 %v254_v59, 30  ;;  %v1422_v61 = vpop.permute.xlu0 %1421  ;;  %v2074_v59 = vor.u32 %v2258_v60, %v2071_v0 }
  0x81   :  { %v256_v6 = vshll.u32 %v255_v5, 30  ;;  %v279_v26 = vsub.s32 4, %v255_v5  ;;  %1213 = vmatpush.bf16.msra.mxu0 %v2074_v59  ;;  %v1959_v59 = vld [vmem:[%s3408_s2 + $0x308] sm:$0xf0] }
  0x82   :  { %1168 = vmatmul.bf16.vlgmr.msrb.gmra.mxu0 %v2691_v34  ;;  %v2271_v34 = vld [vmem:[%s3409_s3 + $0x34] sm:$0xf0] }
  0x83   :  { %v257_v7 = vsub.s32 %v253_v4, %v256_v6  ;;  %v280_v54 = vsel %vm157_vm14, %v279_v26, %v255_v5  ;;  %v3191_v4 = vmul.f32 %v2294_v3, %v1422_v61  ;;  %v1858_v5 = vor.u32 %v2204_v1, %v1855_v2  ;;  %v2220_v6 = vld [vmem:[%s3408_s2 + $0x2b4] sm:$0xf]  ;;  %v1895_v2 = vld [vmem:[%s3408_s2 + $0x288] sm:$0xf0]  ;;  %v2230_v3 = vld [vmem:[%s3408_s2 + $0x304] sm:$0xf] }
  0x84   :  { %v1834_v1 = vor.u32 %v2198_v53, %v1831_v58  ;;  %v2101_v53 = vld [vmem:[%s3409_s3] sm:$0xf] }
  0x85   :  { %vm258_vm12 = vcmp.lt.s32.totalorder %v257_v7, 0  ;;  %v259_v8 = vsub.s32 0, %v257_v7  ;;  %1541 = vrot.lane.b32.xlu2 %v3191_v4, %s2331_s28  ;;  %1177 = vmatpush.bf16.msrb.mxu1 %v1858_v5 }
  0x87   :  { %v260_v9 = vsel %vm258_vm12, %v259_v8, %v257_v7  ;;  %v2236_v8 = vld [vmem:[%s3408_s2 + $0x334] sm:$0xf] }
  0x88   :  { %v261_v10 = vclz %v260_v9 }
  0x8a   :  { %v1569_v11 = vadd.s32 4294967294, %v261_v10  ;;  %v282_v10 = vsel %vm3118_vm15, 0, %v280_v54 }
  0x8b   :  { %v3269_v47 = vand.u32 3, %v282_v10  ;;  %v1382_v60 = vadd.s32 3, %v282_v10 }
  0x8c   :  { %vm1570_vm13 = vcmp.lt.s32.totalorder %v1569_v11, 0 }
  0x8d   :  { %v264_v12 = vsel %vm1570_vm13, 0, %v1569_v11  ;;  %vm300_vm1 = vcmp.lt.s32.totalorder %v3269_v47, 2  ;;  %vm301_vm2 = vcmp.eq.s32.totalorder %v3269_v47, 0  ;;  %vm304_vm3 = vcmp.eq.s32.totalorder %v3269_v47, 2 }
  0x8e   :  { %v265_v13 = vsub.s32 32, %v264_v12  ;;  %v266_v14 = vshll.u32 %v257_v7, %v264_v12  ;;  %v269_v15 = vsub.s32 4294967266, %v264_v12  ;;  %v1919_v7 = vld [vmem:[%s3408_s2 + $0x2b8] sm:$0xf0]  ;;  %v2256_v12 = vld [vmem:[%s3408_s2 + $0x3d4] sm:$0xf] }
  0x8f   :  { %v1922_v11 = vor.u32 %v2220_v6, %v1919_v7  ;;  %v2250_v6 = vld [vmem:[%s3408_s2 + $0x3a4] sm:$0xf]  ;;  %v2039_v7 = vld [vmem:[%s3408_s2 + $0x3a8] sm:$0xf0]  ;;  %vm1550_vm13 = vcmask 517120  }
  0x90   :  { %v267_v55 = vshrl.u32 %v249_v21, %v265_v13  ;;  %v270_v29 = vadd.s32 127, %v269_v15  ;;  %v1983_v21 = vld [vmem:[%s3408_s2 + $0x338] sm:$0xf0]  ;;  %v2202_v15 = vld [vmem:[%s3408_s2 + $0x224] sm:$0xf] }
  0x91   :  { %v1986_v13 = vor.u32 %v2236_v8, %v1983_v21  ;;  %1190 = vmatpush.bf16.msrb.mxu2 %v1922_v11  ;;  %v2125_v8 = vld [vmem:[%s3409_s3 + $0x30] sm:$0xf]  ;;  %v1962_v11 = vor.u32 %v2230_v3, %v1959_v59  ;;  %v1383_v21 = vand.u32 3, %v1382_v60  ;;  %v1425_v59 = vpack.c.bf16 %v3191_v4, %v3191_v4 }
  0x92   :  { %v268_v24 = vor.u32 %v267_v55, %v266_v14  ;;  %v271_v25 = vshll.u32 %v270_v29, 23  ;;  %v2063_v14 = vld [vmem:[%s3408_s2 + $0x3d8] sm:$0xf0]  ;;  %v1847_v55 = vld [vmem:[%s3408_s2 + $0x228] sm:$0xf0] }
  0x93   :  { %v2066_v28 = vor.u32 %v2256_v12, %v2063_v14  ;;  %v1850_v18 = vor.u32 %v2202_v15, %v1847_v55  ;;  %1203 = vmatpush.bf16.msrb.mxu3 %v1986_v13  ;;  %v2042_v12 = vor.u32 %v2250_v6, %v2039_v7  ;;  %v2126_v13 = vor.u32 %v2271_v34, %v2125_v8  ;;  %v2270_v14 = vld [vmem:[%s3409_s3 + $0x34] sm:$0xf]  ;;  %v2127_v15 = vld [vmem:[%s3409_s3 + $0x38] sm:$0xf0] }
  0x94   :  { %v272_v36 = vor.u32 4788187, %v271_v25  ;;  %v275_v22 = vcvt.s32.f32 %v268_v24  ;;  %v1911_v24 = vld [vmem:[%s3408_s2 + $0x2a8] sm:$0xf0]  ;;  %v2234_v25 = vld [vmem:[%s3408_s2 + $0x324] sm:$0xf] }
  0x95   :  { %v1914_v30 = vor.u32 %v2218_v19, %v1911_v24  ;;  %v1978_v17 = vor.u32 %v2234_v25, %v1975_v45  ;;  %1214 = vmatpush.bf16.msra.mxu0 %v2066_v28  ;;  %1178 = vmatpush.bf16.msrb.mxu1 %v1850_v18  ;;  %v2130_v28 = vor.u32 %v2270_v14, %v2127_v15  ;;  %v2248_v18 = vld [vmem:[%s3408_s2 + $0x394] sm:$0xf]  ;;  %v2117_v19 = vld [vmem:[%s3409_s3 + $0x20] sm:$0xf]  ;;  %v2269_v24 = vld [vmem:[%s3409_s3 + $0x24] sm:$0xf0] }
  0x96   :  { %v273_v46 = vand.u32 2147483647, %v272_v36  ;;  %v1839_v36 = vld [vmem:[%s3408_s2 + $0x218] sm:$0xf0]  ;;  %v2119_v45 = vld [vmem:[%s3409_s3 + $0x28] sm:$0xf0] }
  0x97   :  { %v1842_v44 = vor.u32 %v2200_v35, %v1839_v36  ;;  %1191 = vmatpush.bf16.msrb.mxu2 %v1914_v30  ;;  %1204 = vmatpush.bf16.msrb.mxu3 %v1978_v17  ;;  %v2031_v25 = vld [vmem:[%s3408_s2 + $0x398] sm:$0xf0]  ;;  %v2268_v30 = vld [vmem:[%s3409_s3 + $0x24] sm:$0xf]  ;;  %v2109_v17 = vld [vmem:[%s3409_s3 + $0x10] sm:$0xf] }
  0x98   :  { %v276_v62 = vmul.f32 %v275_v22, %v273_v46  ;;  %v2216_v22 = vld [vmem:[%s3408_s2 + $0x294] sm:$0xf]  ;;  %vm1384_vm4 = vcmp.lt.s32.totalorder %v1383_v21, 2  ;;  %vm1388_vm5 = vcmp.eq.s32.totalorder %v1383_v21, 2  ;;  %v2122_v35 = vor.u32 %v2268_v30, %v2119_v45  ;;  %v2246_v36 = vld [vmem:[%s3408_s2 + $0x384] sm:$0xf] }
  0x99   :  { %v2252_v46 = vld [vmem:[%s3408_s2 + $0x3b4] sm:$0xf]  ;;  %v1906_v50 = vor.u32 %v2216_v22, %v1903_v23  ;;  %1215 = vmatpush.bf16.msra.mxu0 %v2058_v43  ;;  %1179 = vmatpush.bf16.msrb.mxu1 %v1842_v44  ;;  %v2267_v22 = vld [vmem:[%s3409_s3 + $0x14] sm:$0xf0]  ;;  %vm1385_vm6 = vcmp.eq.s32.totalorder %v1383_v21, 0  ;;  %v2034_v40 = vor.u32 %v2248_v18, %v2031_v25 }
  0x9a   :  { %v277_v9 = vxor.u32 2147483648, %v276_v62  ;;  %v2050_v61 = vor.u32 %v2252_v46, %v2047_v52  ;;  %v2087_v43 = vld [vmem:[%s3408_s2 + $0x408] sm:$0x70] }
  0x9b   :  { %1192 = vmatpush.bf16.msrb.mxu2 %v1906_v50  ;;  %1205 = vmatpush.bf16.msrb.mxu3 %v1970_v57 }
  0x9c   :  { %v278_v29 = vsel %vm157_vm14, %v277_v9, %v276_v62  ;;  %v2214_v62 = vld [vmem:[%s3408_s2 + $0x284] sm:$0xf] }
  0x9d   :  { %v3235_v26 = vsel %vm3118_vm15, %v2909_v16, %v278_v29  ;;  %v1898_v5 = vor.u32 %v2214_v62, %v1895_v2  ;;  %1216 = vmatpush.bf16.msra.mxu0 %v2050_v61  ;;  %1180 = vmatpush.bf16.msrb.mxu1 %v1834_v1  ;;  %v2264_v62 = vld [vmem:[%s3409_s3 + $0x4] sm:$0xf] }
  0x9e   :  { %v283_v32 = vmul.f32 %v3235_v26, %v3235_v26 }
  0x9f   :  { %1193 = vmatpush.bf16.msrb.mxu2 %v1898_v5  ;;  %1206 = vmatpush.bf16.msrb.mxu3 %v1962_v11 }
  0xa0   :  { %v284_v41 = vmul.f32 -0.001358992, %v283_v32  ;;  %v291_v42 = vmul.f32 -0.00019511016, %v283_v32  ;;  %1181 = vmatmul.bf16.vlgmr.msrb.gmra.mxu1 %v2839_v48  ;;  %v2023_v48 = vld [vmem:[%s3408_s2 + $0x388] sm:$0xf0] }
  0xa1   :  { %1217 = vmatpush.bf16.msra.mxu0 %v2042_v12  ;;  %v2026_v52 = vor.u32 %v2246_v36, %v2023_v48 }
  0xa2   :  { %v285_v54 = vadd.f32 0.041655596, %v284_v41  ;;  %v292_v56 = vadd.f32 0.008332121, %v291_v42  ;;  %1194 = vmatmul.bf16.vlgmr.msrb.gmra.mxu2 %v2842_v49  ;;  %v2266_v41 = vld [vmem:[%s3409_s3 + $0x14] sm:$0xf]  ;;  %1207 = vmatmul.bf16.vlgmr.msrb.gmra.mxu3 %v2819_v37  ;;  %v2110_v42 = vor.u32 %v2267_v22, %v2109_v17 }
  0xa3   :  { %1489 = vmatpush.bf16.msra.mxu2 %v2126_v13  ;;  %1502 = vmatpush.bf16.msra.mxu3 %v2130_v28  ;;  %v2262_v49 = vld [vmem:[%s3408_s2 + $0x404] sm:$0xf] }
  0xa4   :  { %v286_v63 = vmul.f32 %v285_v54, %v283_v32  ;;  %v293_v0 = vmul.f32 %v292_v56, %v283_v32  ;;  %v2090_v37 = vor.u32 %v2262_v49, %v2087_v43  ;;  %v2265_v54 = vld [vmem:[%s3409_s3 + $0x4] sm:$0xf0] }
  0xa5   :  { %1218 = vmatpush.bf16.msra.mxu0 %v2034_v40  ;;  %v2102_v2 = vor.u32 %v2265_v54, %v2101_v53 }
  0xa6   :  { %v287_v9 = vadd.f32 -0.4999988, %v286_v63  ;;  %v294_v10 = vadd.f32 -0.16666654, %v293_v0  ;;  %v1002_v60 = vand.u32 %v2090_v37, %v2792_v20  ;;  %v2103_v63 = vld [vmem:[%s3409_s3 + $0x8] sm:$0xf0]  ;;  %v1013_v20 = vpop.f32.mrf.mxu0  ;;  %v1026_v47 = vpop.f32.mrf.mxu1 }
  0xa7   :  { %1503 = vmatpush.bf16.msra.mxu3 %v2122_v35  ;;  %v2106_v3 = vor.u32 %v2264_v62, %v2103_v63 }
  0xa8   :  { %v288_v55 = vmul.f32 %v287_v9, %v283_v32  ;;  %v295_v29 = vmul.f32 %v294_v10, %v283_v32  ;;  %v2118_v32 = vor.u32 %v2269_v24, %v2117_v19  ;;  %1232 = vmatpush.bf16.msra.mxu1 %v1002_v60 }
  0xa9   :  { %1219 = vmatpush.bf16.msra.mxu0 %v2026_v52 }
  0xaa   :  { %v289_v31 = vadd.f32 1.0, %v288_v55  ;;  %v296_v27 = vadd.f32 1.0, %v295_v29  ;;  %1490 = vmatpush.bf16.msra.mxu2 %v2118_v32  ;;  %v1039_v5 = vpop.f32.mrf.mxu2 }
  0xac   :  { %v297_v23 = vmul.f32 %v296_v27, %v3235_v26  ;;  %v305_v38 = vxor.u32 2147483648, %v289_v31  ;;  %v2111_v26 = vld [vmem:[%s3409_s3 + $0x18] sm:$0xf0]  ;;  %1220 = vmatmul.bf16.vlgmr.msra.gmra.mxu0 %v2847_v51 }
  0xad   :  { %v2114_v58 = vor.u32 %v2266_v41, %v2111_v26  ;;  %v2096_v41 = vld [vmem:[%s3410_s4 + $0x1] ss:$4 sm:$0x3] }
  0xae   :  { %v302_v44 = vxor.u32 2147483648, %v297_v23  ;;  %v306_v46 = vsel %vm304_vm3, %v305_v38, %v297_v23  ;;  %v1390_v50 = vsel %vm1388_vm5, %v305_v38, %v297_v23  ;;  %1491 = vmatpush.bf16.msra.mxu2 %v2110_v42  ;;  %v1052_v6 = vpop.f32.mrf.mxu3  ;;  %v1015_v7 = vpop.f32.mrf.mxu0  ;;  %v1401_v49 = vperm.slane %v2096_v41, 0 }
  0xaf   :  { %1504 = vmatpush.bf16.msra.mxu3 %v2114_v58  ;;  %v1028_v8 = vpop.f32.mrf.mxu1  ;;  %v2098_v58 = vld [vmem:[%s3410_s4 + $0x3] ss:$4 sm:$0x3] }
  0xb0   :  { %v303_v56 = vsel %vm301_vm2, %v289_v31, %v302_v44  ;;  %v1387_v57 = vsel %vm1385_vm6, %v289_v31, %v302_v44  ;;  %2092 = vmatmul.msk.bf16.vlgmr.msra.gmra.mxu1 %vm991_vm0, %v3140_v33  ;;  %v1437_v62 = vperm.slane %v2098_v58, 0 }
  0xb1   :  { %v307_v16 = vsel %vm300_vm1, %v303_v56, %v306_v46  ;;  %v1391_v61 = vsel %vm1384_vm4, %v1387_v57, %v1390_v50  ;;  %v2097_v57 = vld [vmem:[%s3410_s4 + $0x2] ss:$4 sm:$0x3] }
  0xb2   :  { %v308_v0 = vsel %vm298_vm7, nan, %v307_v16  ;;  %v1392_v1 = vsel %vm298_vm7, nan, %v1391_v61  ;;  %1492 = vmatpush.bf16.msra.mxu2 %v2102_v2  ;;  %v1041_v9 = vpop.f32.mrf.mxu2  ;;  %v1412_v61 = vperm.slane %v2097_v57, 0 }
  0xb3   :  { %312 = vperm.xlu0 %2285, %v308_v0   ;;  %1397 = vperm.xlu1 %2286, %v1392_v1  }
  0xb4   :  { %1505 = vmatpush.bf16.msra.mxu3 %v2106_v3 }
  0xb5   :  { %2131 = vmatmul.msk.bf16.vlgmr.msra.gmra.mxu2 %vm1481_vm8, %v1425_v59 }
  0xb6   :  { %v1054_v10 = vpop.f32.mrf.mxu3 }
  0xb7   :  { %2132 = vmatmul.msk.bf16.vlgmr.msra.gmra.mxu3 %vm1481_vm8, %v1425_v59 }
  0xbb   :  { %2287 = vset.pattern.permute.xlu0 %v2321_v39  ;;  %v309_v39 = vld [vmem:[%s3410_s4] ss:$4 sm:$0x3]  ;;  %s2332_s4 = smov [#allocation2]  }
  0xbc   :  { %v316_v24 = vperm.slane %v309_v39, 0  ;;  %v317_v46 = vperm.slane %v309_v39, 1  ;;  %v1438_v39 = vperm.slane %v2098_v58, 1  ;;  %s1557_s1 = sshll.u32 %s2332_s4, 4  ;;  %s1558_s1 = int_to_ptr.vmem [resolvable:$true] %s1557_s1 }
  0xc0   :  { %v1078_v21 = vpop.f32.mrf.mxu1 }
  0xc4   :  { %v1065_v11 = vpop.f32.mrf.mxu0 }
  0xc8   :  { %v1104_v12 = vpop.f32.mrf.mxu3  ;;  %v1080_v13 = vpop.f32.mrf.mxu1 }
  0xc9   :  { %v1091_v34 = vpop.f32.mrf.mxu2 }
  0xcc   :  { %v1067_v51 = vpop.f32.mrf.mxu0 }
  0xd0   :  { %v1106_v15 = vpop.f32.mrf.mxu3 }
  0xd1   :  { %v1093_v4 = vpop.f32.mrf.mxu2 }
  0xe0   :  { %v1130_v29 = vpop.f32.mrf.mxu1 }
  0xe8   :  { %v1156_v18 = vpop.f32.mrf.mxu3  ;;  %v1132_v19 = vpop.f32.mrf.mxu1 }
  0xe9   :  { %v1143_v55 = vpop.f32.mrf.mxu2 }
  0xee   :  { %v1117_v14 = vpop.f32.mrf.mxu0 }
  0xf0   :  { %v1158_v31 = vpop.f32.mrf.mxu3 }
  0xf1   :  { %v1145_v28 = vpop.f32.mrf.mxu2 }
  0xf6   :  { %v1119_v33 = vpop.f32.mrf.mxu0 }
  0xff   :  { %v1169_v25 = vpop.f32.mrf.mxu0 }
 0x107   :  { %v1171_v35 = vpop.f32.mrf.mxu0 }
 0x11d   :  { %v1182_v32 = vpop.f32.mrf.mxu1 }
 0x125   :  { %v313_v30 = vpop.permute.xlu0 %312  ;;  %v1195_v23 = vpop.f32.mrf.mxu2 }
 0x126   :  { %v320_v45 = vmul.f32 %v316_v24, %v313_v30  ;;  %v1208_v40 = vpop.f32.mrf.mxu3  ;;  %v1184_v48 = vpop.f32.mrf.mxu1  ;;  %v321_v60 = vmul.f32 %v317_v46, %v313_v30 }
 0x127   :  { %v1398_v44 = vpop.permute.xlu1 %1397 }
 0x128   :  { %v1014_v27 = vadd.f32 %v1013_v20, %v320_v45  ;;  %v1405_v53 = vmul.f32 %v1401_v49, %v1398_v44  ;;  %v1131_v0 = vadd.f32 %v1130_v29, %v321_v60 }
 0x129   :  { %v1221_v43 = vpop.f32.mrf.mxu0 }
 0x12a   :  { %v1027_v17 = vadd.f32 %v1026_v47, %v1014_v27  ;;  %v1144_v59 = vadd.f32 %v1143_v55, %v1131_v0 }
 0x12c   :  { %v1040_v36 = vadd.f32 %v1039_v5, %v1027_v17  ;;  %v1157_v7 = vadd.f32 %v1156_v18, %v1144_v59 }
 0x12d   :  { %v1197_v37 = vpop.f32.mrf.mxu2 }
 0x12e   :  { %v1053_v22 = vadd.f32 %v1052_v6, %v1040_v36  ;;  %v1210_v54 = vpop.f32.mrf.mxu3  ;;  %v1234_v56 = vpop.f32.mrf.mxu1  ;;  %v1170_v10 = vadd.f32 %v1169_v25, %v1157_v7  ;;  %v1413_v25 = vperm.slane %v2097_v57, 1 }
 0x130   :  { %v1066_v38 = vadd.f32 %v1065_v11, %v1053_v22  ;;  %v1183_v51 = vadd.f32 %v1182_v32, %v1170_v10 }
 0x131   :  { %v1223_v63 = vpop.f32.mrf.mxu0 }
 0x132   :  { %v1079_v42 = vadd.f32 %v1078_v21, %v1066_v38  ;;  %v1196_v21 = vadd.f32 %v1195_v23, %v1183_v51  ;;  %v1542_v38 = vpop.permute.xlu2 %1541 }
 0x134   :  { %v1092_v26 = vadd.f32 %v1091_v34, %v1079_v42  ;;  %v1209_v4 = vadd.f32 %v1208_v40, %v1196_v21 }
 0x136   :  { %v1105_v50 = vadd.f32 %v1104_v12, %v1092_v26  ;;  %v1236_v3 = vpop.f32.mrf.mxu1  ;;  %v1402_v12 = vperm.slane %v2096_v41, 1 }
 0x138   :  { %v1118_v52 = vadd.f32 %v1117_v14, %v1105_v50  ;;  %v1494_v1 = vpop.f32.mrf.mxu2  ;;  %v1222_v14 = vadd.f32 %v1221_v43, %v1209_v4  ;;  %v1406_v29 = vmul.f32 %v1402_v12, %v1398_v44 }
 0x139   :  { %v1495_v20 = vadd.f32 %v1494_v1, %v1437_v62 }
 0x13a   :  { %v1407_v16 = vadd.f32 %v1405_v53, %v1118_v52  ;;  %v1507_v47 = vpop.f32.mrf.mxu3  ;;  %v1235_v33 = vadd.f32 %v1234_v56, %v1222_v14 }
 0x13b   :  { %v1508_v31 = vadd.f32 %v1507_v47, %v1438_v39 }
 0x13c   :  { %v1416_v2 = vadd.f32 %v1412_v61, %v1407_v16  ;;  %v1408_v24 = vadd.f32 %v1406_v29, %v1235_v33 }
 0x13e   :  { %v1511_v5 = vadd.f32 %v1495_v20, %v1416_v2  ;;  %v1417_v17 = vadd.f32 %v1413_v25, %v1408_v24 }
 0x140   :  { %v2133_v6 = vmul.f32 -1.442695, %v1511_v5  ;;  %v1496_v8 = vpop.f32.mrf.mxu2 }
 0x142   :  { %2288 = vpow2.f32 %v2133_v6  ;;  %v1509_v9 = vpop.f32.mrf.mxu3 }
 0x148   :  { %v2289_v11 = vpop.eup %2288 }
 0x149   :  { %v1515_v34 = vadd.f32 1.0, %v2289_v11 }
 0x14b   :  { %2290 = vrcp.f32 %v1515_v34  ;;  %v1527_v28 = vand.u32 2147483648, %v1515_v34  ;;  %v1525_v19 = vand.u32 2147483647, %v1515_v34  ;;  %vm1521_vm10 = vweird.f32 %v1515_v34 }
 0x14d   :  { %v1528_v45 = vor.u32 1.1754944e-38, %v1527_v28  ;;  %vm1526_vm12 = vcmp.eq.f32.partialorder %v1525_v19, 8.507059e+37 }
 0x151   :  { %v2291_v13 = vpop.eup %2290 }
 0x152   :  { %v1517_v15 = vmul.f32 %v2291_v13, %v1515_v34  ;;  %vm1522_vm9 = vweird.f32 %v2291_v13 }
 0x153   :  { %vm1523_vm11 = vmor %vm1521_vm10, %vm1522_vm9 }
 0x154   :  { %v1518_v55 = vsub.f32 1.0, %v1517_v15 }
 0x156   :  { %v1519_v18 = vmul.f32 %v2291_v13, %v1518_v55 }
 0x158   :  { %v1520_v30 = vadd.f32 %v2291_v13, %v1519_v18 }
 0x15a   :  { %v1524_v27 = vsel %vm1523_vm11, %v2291_v13, %v1520_v30 }
 0x15b   :  { %v1529_v32 = vsel %vm1526_vm12, %v1528_v45, %v1524_v27 }
 0x15c   :  { %v1531_v35 = vmul.f32 %v1529_v32, %v1508_v31  ;;  %v1534_v23 = vsub.f32 1.0, %v1529_v32  ;;  %v1544_v48 = vmul.f32 %v1542_v38, %v1529_v32 }
 0x15e   :  { %v1532_v36 = vadd.f32 %v1531_v35, %v1417_v17 }
 0x160   :  { %2292 = vtanh.f32 %v1532_v36 }
 0x166   :  { %v2293_v22 = vpop.eup %2292 }
 0x167   :  { %1536 = vrot.lane.b32.xlu1 %v2293_v22, %s2331_s28 }
 0x1d9   :  { %v1537_v40 = vpop.permute.xlu1 %1536 }
 0x1da   :  { %v1539_v41 = vmul.f32 %v1537_v40, %v1534_v23 }
 0x1dc   :  { %v1545_v42 = vadd.f32 %v1544_v48, %v1539_v41 }
 0x1de   :  { %1547 = vrot.lane.b32.xlu2 %v1545_v42, %s2331_s28 }
 0x238   :  { %v1548_v26 = vpop.permute.xlu2 %1547 }
 0x239   :  { %1551 = vst.msk [vmem:[#allocation2] sm:$0x3] %vm1550_vm13, %v1548_v26 }
 0x23a   :  { %1562 = dma.vmem_to_hbm [thread:$0]  %s1558_s1, 32, %s1560_s0, [#allocation3]  }
 0x23b   :  { %2319 = dma.done.wait [#allocation3], 32  }
 0x23c   :  { %2320 = vsyncadd [#allocation3], 4294967264 }
 0x23d   :  { %1567 = vsyncpa [#allocation3], 1 }

</bundles_post_ra>
